<compile_context>
chip_gen: v6e
topology: v6e:2x2x1
jax: 0.10.0
libtpu: 0.0.40
codegen_flags: <defaults>
</compile_context>

<pallas_src>
import numpy as np

import jax
import jax.numpy as jnp
from jax import lax
from jax.experimental import pallas as pl
from jax.experimental.pallas import tpu as pltpu


# MXU operand dtype for the fused GEMMs (accumulation is always f32).
# Set to jnp.float32 for bit-faithful f32 conv semantics at a lower MXU rate.
GEMM_DTYPE = jnp.bfloat16

# Row-tile target for the M (= batch*spatial) axis.  256 is safe on v5e (16 MiB scoped
# VMEM default) and v7x (64 MiB physical VMEM); raise to 512-1024 on v6e for big inputs.
TM_TARGET = 256

KSIZE = 8       # DownBlock default kernel_size
STRIDE = 4      # DownBlock default stride
PAD = 2         # DownBlock default padding


def _round_up(x, m):
    return (x + m - 1) // m * m


def _pad2(arr, rows, cols):
    r, c = arr.shape
    if r == rows and c == cols:
        return arr
    return jnp.zeros((rows, cols), arr.dtype).at[:r, :c].set(arr)


# ----------------------------- Pallas kernels ---------------------------------------

def _gemm_bias_prelu_kernel(a_ref, p_ref, w_ref, b_ref, o_ref):
    # o = PReLU(p @ w + b); a_ref holds the scalar PReLU slope in SMEM.
    acc = jnp.dot(p_ref[...], w_ref[...], preferred_element_type=jnp.float32)
    acc = acc + b_ref[...]
    slope = a_ref[0]
    o_ref[...] = jnp.where(acc >= 0.0, acc, slope * acc).astype(o_ref.dtype)


def _gemm_bias_prelu_res_kernel(a_ref, p_ref, w_ref, b_ref, r_ref, o_ref):
    # o = PReLU(p @ w + b) + r   (fused residual add: l1 + l0)
    acc = jnp.dot(p_ref[...], w_ref[...], preferred_element_type=jnp.float32)
    acc = acc + b_ref[...]
    slope = a_ref[0]
    y = jnp.where(acc >= 0.0, acc, slope * acc)
    o_ref[...] = (y + r_ref[...]).astype(o_ref.dtype)


def _fused_gemm(patches, wmat, bias, prelu_a, residual=None, tm_target=TM_TARGET):
    """PReLU(patches @ wmat + bias) (+ residual), as one M-tiled Pallas kernel.

    patches: (M, K) f32   wmat: (K, J) f32   bias: (J,) f32   prelu_a: scalar
    residual: optional (M, J) f32 added after the activation.  Returns (M, J) f32.
    """
    M, K = patches.shape
    Kw, J = wmat.shape
    assert Kw == K

    Jp = _round_up(J, 128)                    # lane-dense output columns
    Kp = _round_up(K, 128)                    # aligned contraction dim
    Mp = _round_up(M, 8)
    TM = min(_round_up(tm_target, 8), Mp)
    Mp = _round_up(Mp, TM)

    p = _pad2(patches.astype(GEMM_DTYPE), Mp, Kp)
    w = _pad2(wmat.astype(GEMM_DTYPE), Kp, Jp)
    b = _pad2(bias.astype(jnp.float32).reshape(1, J), 1, Jp)
    a = jnp.asarray(prelu_a, jnp.float32).reshape(1)

    inputs = [a, p, w, b]
    in_specs = [
        pl.BlockSpec(memory_space=pltpu.MemorySpace.SMEM),   # PReLU slope (scalar)
        pl.BlockSpec((TM, Kp), lambda i: (i, 0)),            # patch row tile (pipelined)
        pl.BlockSpec((Kp, Jp), lambda i: (0, 0)),            # weights (resident)
        pl.BlockSpec((1, Jp), lambda i: (0, 0)),             # bias (resident)
    ]
    if residual is None:
        kernel = _gemm_bias_prelu_kernel
    else:
        kernel = _gemm_bias_prelu_res_kernel
        inputs.append(_pad2(residual.astype(jnp.float32), Mp, Jp))
        in_specs.append(pl.BlockSpec((TM, Jp), lambda i: (i, 0)))

    out = pl.pallas_call(
        kernel,
        out_shape=jax.ShapeDtypeStruct((Mp, Jp), jnp.float32),
        grid_spec=pltpu.PrefetchScalarGridSpec(
            num_scalar_prefetch=0,
            grid=(Mp // TM,),
            in_specs=in_specs,
            out_specs=pl.BlockSpec((TM, Jp), lambda i: (i, 0)),
        ),
        compiler_params=pltpu.CompilerParams(
            dimension_semantics=("parallel",),   # independent M tiles -> both TCs on v7x
            vmem_limit_bytes=32 * 1024 * 1024,
        ),
    )(*inputs)
    return out[:M, :J]


# ----------------------------- wrapper glue ------------------------------------------

def _im2col_k8s4p2(x):
    """im2col for Conv2d(k=8, s=4, p=2) on NCHW x -> (N*OH*OW, C*64).

    Row order (n, oy, ox); column order (c, ky, kx).
    """
    # TODO(synk): build these tiles inside the kernel (pl.ds over a padded input-row
    # window) to avoid materializing the 4x-duplicated patch array in HBM for very
    # large activations; at these sizes the XLA-fused gather is cheap.
    N, C, H, W = x.shape
    OH = (H + 2 * PAD - KSIZE) // STRIDE + 1
    OW = (W + 2 * PAD - KSIZE) // STRIDE + 1
    xp = jnp.pad(x, ((0, 0), (0, 0), (PAD, PAD), (PAD, PAD)))
    shards = [
        xp[:, :, a:a + STRIDE * (OH - 1) + 1:STRIDE, b:b + STRIDE * (OW - 1) + 1:STRIDE]
        for a in range(KSIZE) for b in range(KSIZE)
    ]
    pat = jnp.stack(shards, axis=2)                 # (N, C, 64, OH, OW), tap = ky*8+kx
    pat = jnp.transpose(pat, (0, 3, 4, 1, 2))       # (N, OH, OW, C, 64)
    return pat.reshape(N * OH * OW, C * KSIZE * KSIZE), (OH, OW)


def _im2col_3x3(x_nhwc):
    """3x3 / stride-1 / pad-1 im2col on NHWC -> (N*H*W, 9*C); columns ordered (dy, dx, c)."""
    N, H, W, C = x_nhwc.shape
    xp = jnp.pad(x_nhwc, ((0, 0), (1, 1), (1, 1), (0, 0)))
    shards = [xp[:, dy:dy + H, dx:dx + W, :] for dy in range(3) for dx in range(3)]
    pat = jnp.stack(shards, axis=3)                 # (N, H, W, 9, C)
    return pat.reshape(N * H * W, 9 * C)


def _conv_weight_to_gemm(w):
    """Conv2d weight (Cout, Cin, 8, 8) -> (Cin*64, Cout), matching _im2col_k8s4p2 columns."""
    Cin = w.shape[1]
    return jnp.transpose(w, (1, 2, 3, 0)).reshape(Cin * KSIZE * KSIZE, w.shape[0])


# Sub-pixel (polyphase) repack of ConvTranspose2d(k=8, s=4, p=2):
#   out[n, co, 4q+my, 4r+mx] = b[co]
#     + sum_{ci,dy,dx} l0pad[n, ci, q+dy, r+dx] * Wt[ci, co, 6-4*dy+my, 6-4*dx+mx]
# (taps with 6-4*d+m outside [0,8) do not exist -> zero), l0pad = l0 zero-padded by 1.
# So the deconv is ONE dense 3x3-conv GEMM with 16*Cout "phase" columns + pixel shuffle.
_PHASE_SEL = np.zeros((3, 4, KSIZE), np.float32)     # [d, m, k] = 1 iff k == 6 - 4d + m
for _d in range(3):
    for _m in range(4):
        _k = 6 - 4 * _d + _m
        if 0 <= _k < KSIZE:
            _PHASE_SEL[_d, _m, _k] = 1.0


def _deconv_weight_to_gemm(wt):
    """ConvTranspose2d weight (Cin, Cout, 8, 8) -> (9*Cin, 16*Cout).

    Row order (dy, dx, ci) matches _im2col_3x3; column order (my, mx, co).
    """
    Cin, Cout = wt.shape[0], wt.shape[1]
    sel = jnp.asarray(_PHASE_SEL)
    w2 = jnp.einsum('pyk,qxl,cokl->pqcyxo', sel, sel, wt,
                    precision=lax.Precision.HIGHEST)          # (3,3,Cin,4,4,Cout), exact
    return w2.reshape(9 * Cin, 16 * Cout)


@jax.jit
def down_block(x, w1, b1, a1, w2, b2, a2, w3, b3, a3):
    """DownBlock forward.  x: (N, C, H, W) f32 with H, W multiples of 4.

    w1, w3: Conv2d weights (C, C, 8, 8); w2: ConvTranspose2d weight (C, C, 8, 8);
    b*: (C,) biases; a*: scalar PReLU slopes.  Returns (N, C, H//4, W//4).
    """
    N, C, H, W = x.shape
    assert H % STRIDE == 0 and W % STRIDE == 0

    # stage 1: l0 = PReLU(conv_down(x))
    patches1, (OH, OW) = _im2col_k8s4p2(x)
    l0_flat = _fused_gemm(patches1, _conv_weight_to_gemm(w1), b1, a1)      # (N*OH*OW, C)

    # stage 2: h0 = PReLU(deconv_up(l0))  -- polyphase GEMM + pixel shuffle
    l0_nhwc = l0_flat.reshape(N, OH, OW, C)
    patches2 = _im2col_3x3(l0_nhwc)                                        # (N*OH*OW, 9C)
    h0_flat = _fused_gemm(patches2, _deconv_weight_to_gemm(w2),
                          jnp.tile(b2, 16), a2)                            # (N*OH*OW, 16C)
    h0 = (h0_flat.reshape(N, OH, OW, STRIDE, STRIDE, C)
          .transpose(0, 5, 1, 3, 2, 4)
          .reshape(N, C, H, W))

    # stage 3: l1 = PReLU(conv_down(h0 - x));  return l1 + l0 (residual fused in-kernel)
    patches3, _ = _im2col_k8s4p2(h0 - x)
    out_flat = _fused_gemm(patches3, _conv_weight_to_gemm(w3), b3, a3,
                           residual=l0_flat)                               # (N*OH*OW, C)
    return out_flat.reshape(N, OH, OW, C).transpose(0, 3, 1, 2)


# ----------------------------- pure-JAX reference ------------------------------------

def _reference(x, w1, b1, a1, w2, b2, a2, w3, b3, a3):
    """XLA reference for DownBlock.  Conv operands are rounded to GEMM_DTYPE so the
    check validates the Pallas lowering (indexing / fusion / polyphase repack) rather
    than the deliberate bf16-operand MXU precision choice."""
    def q(t):
        return t.astype(GEMM_DTYPE).astype(jnp.float32)

    def prelu(v, a):
        return jnp.where(v >= 0, v, a * v)

    def conv_down(v, w, b):
        out = lax.conv_general_dilated(
            q(v), q(w), window_strides=(STRIDE, STRIDE),
            padding=((PAD, PAD), (PAD, PAD)),
            dimension_numbers=("NCHW", "OIHW", "NCHW"),
            precision=lax.Precision.HIGHEST)
        return out + b.reshape(1, -1, 1, 1)

    def deconv_up(v, wt, b):
        w_conv = jnp.transpose(wt[:, :, ::-1, ::-1], (1, 0, 2, 3))   # (Cout, Cin, 8, 8)
        out = lax.conv_general_dilated(
            q(v), q(w_conv), window_strides=(1, 1),
            padding=((KSIZE - 1 - PAD,) * 2, (KSIZE - 1 - PAD,) * 2),
            lhs_dilation=(STRIDE, STRIDE),
            dimension_numbers=("NCHW", "OIHW", "NCHW"),
            precision=lax.Precision.HIGHEST)
        return out + b.reshape(1, -1, 1, 1)

    l0 = prelu(conv_down(x, w1, b1), a1)
    h0 = prelu(deconv_up(l0, w2, b2), a2)
    l1 = prelu(conv_down(h0 - x, w3, b3), a3)
    return l1 + l0


if __name__ == "__main__":
    key = jax.random.PRNGKey(0)
    ks = jax.random.split(key, 8)

    N, C, H, W = 2, 8, 16, 16                 # num_filter=8, 16x16 input -> 4x4 output
    x = jax.random.normal(ks[0], (N, C, H, W), dtype=jnp.float32)
    w1 = 0.1 * jax.random.normal(ks[1], (C, C, KSIZE, KSIZE), dtype=jnp.float32)
    b1 = 0.1 * jax.random.normal(ks[2], (C,), dtype=jnp.float32)
    w2 = 0.1 * jax.random.normal(ks[3], (C, C, KSIZE, KSIZE), dtype=jnp.float32)
    b2 = 0.1 * jax.random.normal(ks[4], (C,), dtype=jnp.float32)
    w3 = 0.1 * jax.random.normal(ks[5], (C, C, KSIZE, KSIZE), dtype=jnp.float32)
    b3 = 0.1 * jax.random.normal(ks[6], (C,), dtype=jnp.float32)
    a1, a2, a3 = jnp.float32(0.25), jnp.float32(0.2), jnp.float32(0.3)   # PReLU slopes

    out = jax.block_until_ready(down_block(x, w1, b1, a1, w2, b2, a2, w3, b3, a3))
    assert out.shape == (N, C, H // 4, W // 4), out.shape

    ref = jax.block_until_ready(
        jax.jit(_reference)(x, w1, b1, a1, w2, b2, a2, w3, b3, a3))
    err = float(jnp.max(jnp.abs(out - ref)))
    # Bound covers bf16 operand-rounding disagreement propagated through three stages;
    # an indexing/layout bug would produce O(1) errors (output std is ~3).
    assert err < 5e-2, err
    print("KERNEL_OK")
</pallas_src>

<mosaic_0001>
module attributes {stable_mosaic.version = 11 : i64} {
  func.func @_gemm_bias_prelu_kernel(%arg0: i32, %arg1: memref<1xf32, #tpu.memory_space<smem>>, %arg2: memref<32x512xbf16, #tpu.memory_space<vmem>>, %arg3: memref<512x128xbf16, #tpu.memory_space<vmem>>, %arg4: memref<1x128xf32, #tpu.memory_space<vmem>>, %arg5: memref<32x128xf32, #tpu.memory_space<vmem>>) attributes {dimension_semantics = [#tpu.dimension_semantics<parallel>], iteration_bounds = array<i64: 1>, scalar_prefetch = 0 : i64, scratch_operands = 0 : i64, tpu.core_type = #tpu.core_type<tc>, window_params = [{transform_indices = @transform_0, window_bounds = array<i64: 1>}, {transform_indices = @transform_1, window_bounds = array<i64: 32, 512>}, {pipeline_mode = #tpu.pipeline_mode<synchronous>, transform_indices = @transform_2, window_bounds = array<i64: 512, 128>}, {pipeline_mode = #tpu.pipeline_mode<synchronous>, transform_indices = @transform_3, window_bounds = array<i64: 1, 128>}, {transform_indices = @transform_4, window_bounds = array<i64: 32, 128>}]} {
    %c0 = arith.constant 0 : index
    %c0_0 = arith.constant 0 : index
    %0 = vector.load %arg2[%c0, %c0_0] : memref<32x512xbf16, #tpu.memory_space<vmem>>, vector<32x512xbf16>
    %c0_1 = arith.constant 0 : index
    %c0_2 = arith.constant 0 : index
    %1 = vector.load %arg3[%c0_1, %c0_2] : memref<512x128xbf16, #tpu.memory_space<vmem>>, vector<512x128xbf16>
    %cst = arith.constant dense<0.000000e+00> : vector<32x128xf32>
    %2 = tpu.matmul %0, %1, %cst {dimension_numbers = #tpu.dot_dimension_numbers<[1], [0], [0], [1], [0, 0, 1, 1], [], []>} : vector<32x512xbf16>, vector<512x128xbf16>, vector<32x128xf32> -> vector<32x128xf32>
    %c0_3 = arith.constant 0 : index
    %c0_4 = arith.constant 0 : index
    %3 = vector.load %arg4[%c0_3, %c0_4] : memref<1x128xf32, #tpu.memory_space<vmem>>, vector<1x128xf32>
    %4 = vector.broadcast %3 : vector<1x128xf32> to vector<32x128xf32>
    %5 = arith.addf %2, %4 : vector<32x128xf32>
    %c0_5 = arith.constant 0 : index
    %6 = memref.load %arg1[%c0_5] : memref<1xf32, #tpu.memory_space<smem>>
    %cst_6 = arith.constant 0.000000e+00 : f32
    %7 = vector.broadcast %cst_6 : f32 to vector<32x128xf32>
    %8 = arith.cmpf oge, %5, %7 : vector<32x128xf32>
    %9 = vector.broadcast %6 : f32 to vector<32x128xf32>
    %10 = arith.mulf %9, %5 : vector<32x128xf32>
    %11 = arith.select %8, %5, %10 : vector<32x128xi1>, vector<32x128xf32>
    %c0_7 = arith.constant 0 : index
    %c0_8 = arith.constant 0 : index
    %12 = vector.load %arg5[%c0_7, %c0_8] : memref<32x128xf32, #tpu.memory_space<vmem>>, vector<32x128xf32>
    tpu.vector_store %arg5[%c0_7, %c0_8], %11 {strides = array<i32>} : memref<32x128xf32, #tpu.memory_space<vmem>>, vector<32x128xf32>,
    return
  }
  func.func @transform_0(%arg0: i32) -> i32 {
    %c0_i32 = arith.constant 0 : i32
    %c0_i32_0 = arith.constant 0 : i32
    return %c0_i32 : i32
  }
  func.func @transform_1(%arg0: i32) -> (i32, i32) {
    %c0_i32 = arith.constant 0 : i32
    %c0_i32_0 = arith.constant 0 : i32
    return %arg0, %c0_i32 : i32, i32
  }
  func.func @transform_2(%arg0: i32) -> (i32, i32) {
    %c0_i32 = arith.constant 0 : i32
    %c0_i32_0 = arith.constant 0 : i32
    %c0_i32_1 = arith.constant 0 : i32
    return %c0_i32, %c0_i32_0 : i32, i32
  }
  func.func @transform_3(%arg0: i32) -> (i32, i32) {
    %c0_i32 = arith.constant 0 : i32
    %c0_i32_0 = arith.constant 0 : i32
    %c0_i32_1 = arith.constant 0 : i32
    return %c0_i32, %c0_i32_0 : i32, i32
  }
  func.func @transform_4(%arg0: i32) -> (i32, i32) {
    %c0_i32 = arith.constant 0 : i32
    %c0_i32_0 = arith.constant 0 : i32
    return %arg0, %c0_i32 : i32, i32
  }
}

module attributes {stable_mosaic.version = 11 : i64} {
  func.func @_gemm_bias_prelu_kernel(%arg0: i32, %arg1: memref<1xf32, #tpu.memory_space<smem>>, %arg2: memref<32x128xbf16, #tpu.memory_space<vmem>>, %arg3: memref<128x128xbf16, #tpu.memory_space<vmem>>, %arg4: memref<1x128xf32, #tpu.memory_space<vmem>>, %arg5: memref<32x128xf32, #tpu.memory_space<vmem>>) attributes {dimension_semantics = [#tpu.dimension_semantics<parallel>], iteration_bounds = array<i64: 1>, scalar_prefetch = 0 : i64, scratch_operands = 0 : i64, tpu.core_type = #tpu.core_type<tc>, window_params = [{transform_indices = @transform_0, window_bounds = array<i64: 1>}, {transform_indices = @transform_1, window_bounds = array<i64: 32, 128>}, {pipeline_mode = #tpu.pipeline_mode<synchronous>, transform_indices = @transform_2, window_bounds = array<i64: 128, 128>}, {pipeline_mode = #tpu.pipeline_mode<synchronous>, transform_indices = @transform_3, window_bounds = array<i64: 1, 128>}, {transform_indices = @transform_4, window_bounds = array<i64: 32, 128>}]} {
    %c0 = arith.constant 0 : index
    %c0_0 = arith.constant 0 : index
    %0 = vector.load %arg2[%c0, %c0_0] : memref<32x128xbf16, #tpu.memory_space<vmem>>, vector<32x128xbf16>
    %c0_1 = arith.constant 0 : index
    %c0_2 = arith.constant 0 : index
    %1 = vector.load %arg3[%c0_1, %c0_2] : memref<128x128xbf16, #tpu.memory_space<vmem>>, vector<128x128xbf16>
    %cst = arith.constant dense<0.000000e+00> : vector<32x128xf32>
    %2 = tpu.matmul %0, %1, %cst {dimension_numbers = #tpu.dot_dimension_numbers<[1], [0], [0], [1], [0, 0, 1, 1], [], []>} : vector<32x128xbf16>, vector<128x128xbf16>, vector<32x128xf32> -> vector<32x128xf32>
    %c0_3 = arith.constant 0 : index
    %c0_4 = arith.constant 0 : index
    %3 = vector.load %arg4[%c0_3, %c0_4] : memref<1x128xf32, #tpu.memory_space<vmem>>, vector<1x128xf32>
    %4 = vector.broadcast %3 : vector<1x128xf32> to vector<32x128xf32>
    %5 = arith.addf %2, %4 : vector<32x128xf32>
    %c0_5 = arith.constant 0 : index
    %6 = memref.load %arg1[%c0_5] : memref<1xf32, #tpu.memory_space<smem>>
    %cst_6 = arith.constant 0.000000e+00 : f32
    %7 = vector.broadcast %cst_6 : f32 to vector<32x128xf32>
    %8 = arith.cmpf oge, %5, %7 : vector<32x128xf32>
    %9 = vector.broadcast %6 : f32 to vector<32x128xf32>
    %10 = arith.mulf %9, %5 : vector<32x128xf32>
    %11 = arith.select %8, %5, %10 : vector<32x128xi1>, vector<32x128xf32>
    %c0_7 = arith.constant 0 : index
    %c0_8 = arith.constant 0 : index
    %12 = vector.load %arg5[%c0_7, %c0_8] : memref<32x128xf32, #tpu.memory_space<vmem>>, vector<32x128xf32>
    tpu.vector_store %arg5[%c0_7, %c0_8], %11 {strides = array<i32>} : memref<32x128xf32, #tpu.memory_space<vmem>>, vector<32x128xf32>,
    return
  }
  func.func @transform_0(%arg0: i32) -> i32 {
    %c0_i32 = arith.constant 0 : i32
    %c0_i32_0 = arith.constant 0 : i32
    return %c0_i32 : i32
  }
  func.func @transform_1(%arg0: i32) -> (i32, i32) {
    %c0_i32 = arith.constant 0 : i32
    %c0_i32_0 = arith.constant 0 : i32
    return %arg0, %c0_i32 : i32, i32
  }
  func.func @transform_2(%arg0: i32) -> (i32, i32) {
    %c0_i32 = arith.constant 0 : i32
    %c0_i32_0 = arith.constant 0 : i32
    %c0_i32_1 = arith.constant 0 : i32
    return %c0_i32, %c0_i32_0 : i32, i32
  }
  func.func @transform_3(%arg0: i32) -> (i32, i32) {
    %c0_i32 = arith.constant 0 : i32
    %c0_i32_0 = arith.constant 0 : i32
    %c0_i32_1 = arith.constant 0 : i32
    return %c0_i32, %c0_i32_0 : i32, i32
  }
  func.func @transform_4(%arg0: i32) -> (i32, i32) {
    %c0_i32 = arith.constant 0 : i32
    %c0_i32_0 = arith.constant 0 : i32
    return %arg0, %c0_i32 : i32, i32
  }
}

module attributes {stable_mosaic.version = 11 : i64} {
  func.func @_gemm_bias_prelu_res_kernel(%arg0: i32, %arg1: memref<1xf32, #tpu.memory_space<smem>>, %arg2: memref<32x512xbf16, #tpu.memory_space<vmem>>, %arg3: memref<512x128xbf16, #tpu.memory_space<vmem>>, %arg4: memref<1x128xf32, #tpu.memory_space<vmem>>, %arg5: memref<32x128xf32, #tpu.memory_space<vmem>>, %arg6: memref<32x128xf32, #tpu.memory_space<vmem>>) attributes {dimension_semantics = [#tpu.dimension_semantics<parallel>], iteration_bounds = array<i64: 1>, scalar_prefetch = 0 : i64, scratch_operands = 0 : i64, tpu.core_type = #tpu.core_type<tc>, window_params = [{transform_indices = @transform_0, window_bounds = array<i64: 1>}, {transform_indices = @transform_1, window_bounds = array<i64: 32, 512>}, {pipeline_mode = #tpu.pipeline_mode<synchronous>, transform_indices = @transform_2, window_bounds = array<i64: 512, 128>}, {pipeline_mode = #tpu.pipeline_mode<synchronous>, transform_indices = @transform_3, window_bounds = array<i64: 1, 128>}, {transform_indices = @transform_4, window_bounds = array<i64: 32, 128>}, {transform_indices = @transform_5, window_bounds = array<i64: 32, 128>}]} {
    %c0 = arith.constant 0 : index
    %c0_0 = arith.constant 0 : index
    %0 = vector.load %arg2[%c0, %c0_0] : memref<32x512xbf16, #tpu.memory_space<vmem>>, vector<32x512xbf16>
    %c0_1 = arith.constant 0 : index
    %c0_2 = arith.constant 0 : index
    %1 = vector.load %arg3[%c0_1, %c0_2] : memref<512x128xbf16, #tpu.memory_space<vmem>>, vector<512x128xbf16>
    %cst = arith.constant dense<0.000000e+00> : vector<32x128xf32>
    %2 = tpu.matmul %0, %1, %cst {dimension_numbers = #tpu.dot_dimension_numbers<[1], [0], [0], [1], [0, 0, 1, 1], [], []>} : vector<32x512xbf16>, vector<512x128xbf16>, vector<32x128xf32> -> vector<32x128xf32>
    %c0_3 = arith.constant 0 : index
    %c0_4 = arith.constant 0 : index
    %3 = vector.load %arg4[%c0_3, %c0_4] : memref<1x128xf32, #tpu.memory_space<vmem>>, vector<1x128xf32>
    %4 = vector.broadcast %3 : vector<1x128xf32> to vector<32x128xf32>
    %5 = arith.addf %2, %4 : vector<32x128xf32>
    %c0_5 = arith.constant 0 : index
    %6 = memref.load %arg1[%c0_5] : memref<1xf32, #tpu.memory_space<smem>>
    %cst_6 = arith.constant 0.000000e+00 : f32
    %7 = vector.broadcast %cst_6 : f32 to vector<32x128xf32>
    %8 = arith.cmpf oge, %5, %7 : vector<32x128xf32>
    %9 = vector.broadcast %6 : f32 to vector<32x128xf32>
    %10 = arith.mulf %9, %5 : vector<32x128xf32>
    %11 = arith.select %8, %5, %10 : vector<32x128xi1>, vector<32x128xf32>
    %c0_7 = arith.constant 0 : index
    %c0_8 = arith.constant 0 : index
    %12 = vector.load %arg5[%c0_7, %c0_8] : memref<32x128xf32, #tpu.memory_space<vmem>>, vector<32x128xf32>
    %13 = arith.addf %11, %12 : vector<32x128xf32>
    %c0_9 = arith.constant 0 : index
    %c0_10 = arith.constant 0 : index
    %14 = vector.load %arg6[%c0_9, %c0_10] : memref<32x128xf32, #tpu.memory_space<vmem>>, vector<32x128xf32>
    tpu.vector_store %arg6[%c0_9, %c0_10], %13 {strides = array<i32>} : memref<32x128xf32, #tpu.memory_space<vmem>>, vector<32x128xf32>,
    return
  }
  func.func @transform_0(%arg0: i32) -> i32 {
    %c0_i32 = arith.constant 0 : i32
    %c0_i32_0 = arith.constant 0 : i32
    return %c0_i32 : i32
  }
  func.func @transform_1(%arg0: i32) -> (i32, i32) {
    %c0_i32 = arith.constant 0 : i32
    %c0_i32_0 = arith.constant 0 : i32
    return %arg0, %c0_i32 : i32, i32
  }
  func.func @transform_2(%arg0: i32) -> (i32, i32) {
    %c0_i32 = arith.constant 0 : i32
    %c0_i32_0 = arith.constant 0 : i32
    %c0_i32_1 = arith.constant 0 : i32
    return %c0_i32, %c0_i32_0 : i32, i32
  }
  func.func @transform_3(%arg0: i32) -> (i32, i32) {
    %c0_i32 = arith.constant 0 : i32
    %c0_i32_0 = arith.constant 0 : i32
    %c0_i32_1 = arith.constant 0 : i32
    return %c0_i32, %c0_i32_0 : i32, i32
  }
  func.func @transform_4(%arg0: i32) -> (i32, i32) {
    %c0_i32 = arith.constant 0 : i32
    %c0_i32_0 = arith.constant 0 : i32
    return %arg0, %c0_i32 : i32, i32
  }
  func.func @transform_5(%arg0: i32) -> (i32, i32) {
    %c0_i32 = arith.constant 0 : i32
    %c0_i32_0 = arith.constant 0 : i32
    return %arg0, %c0_i32 : i32, i32
  }
}

</mosaic_0001>

<bundles_post_ra>
// kernel: tile.9
= control target key start
LH: loop header
LB: loop body
LE: loop exit
PB: predicated region body
PF: predicated region fallthrough
CT: control target
= control target key end

     0   :  { %s133_s10 = smov 120   ;;  %s134_s11 = smov 104   ;;  %vm3_vm0 = vcmask 64512   ;;  %vm9_vm1 = vcmask 1048512   ;;  %vm15_vm2 = vcmask 982912   ;;  %vm21_vm3 = vcmask 917312   ;;  %s209_s0 = inlined_call_operand.vmem [shape: f32[16,8], index: 0, kind: input, shape index: {}]   ;;  %s210_s1 = inlined_call_operand.vmem [shape: f32[1,128], index: 1, kind: output, shape index: {}]  }
   0x1   :  { %v103_v0 = vld [vmem:[%s209_s0 + $0xf] sm:$0x1]   ;;  %v105_v1 = vld [vmem:[%s209_s0 + $0xd] sm:$0x1]   ;;  %v104_v2 = vld [vmem:[%s209_s0 + $0xe] sm:$0x1]  }
   0x2   :  { %7 = vrot.lane.b32.xlu0 %v103_v0, %s133_s10  ;;  %19 = vrot.lane.b32.xlu1 %v105_v1, %s134_s11  ;;  %v106_v3 = vld [vmem:[%s209_s0 + $0xc] sm:$0x1]   ;;  %s135_s16 = smov 112   ;;  %s136_s17 = smov 96   ;;  %v107_v4 = vld [vmem:[%s209_s0 + $0xb] sm:$0x1]  }
   0x3   :  { %v108_v5 = vld [vmem:[%s209_s0 + $0xa] sm:$0x1]   ;;  %v2_v6 = vld [vmem:[%s209_s0] sm:$0x1]   ;;  %s137_s24 = smov 88   ;;  %s138_s25 = smov 80  }
   0x4   :  { %4 = vst.msk [vmem:[#allocation0] sm:$0x1] %vm3_vm0, %v2_v6   ;;  %v109_v7 = vld [vmem:[%s209_s0 + $0x9] sm:$0x1]   ;;  %v110_v8 = vld [vmem:[%s209_s0 + $0x8] sm:$0x1]  }
   0x5   :  { %s139_s30 = smov 72   ;;  %s140_s2 = smov 64   ;;  %v111_v9 = vld [vmem:[%s209_s0 + $0x7] sm:$0x1]   ;;  %v112_v10 = vld [vmem:[%s209_s0 + $0x6] sm:$0x1]  }
   0x6   :  { %13 = vrot.lane.b32.xlu0 %v104_v2, %s135_s16  ;;  %25 = vrot.lane.b32.xlu1 %v106_v3, %s136_s17  ;;  %s141_s7 = smov 56   ;;  %s142_s8 = smov 48   ;;  %v113_v11 = vld [vmem:[%s209_s0 + $0x5] sm:$0x1]   ;;  %v114_v12 = vld [vmem:[%s209_s0 + $0x4] sm:$0x1]  }
   0x7   :  { %s143_s13 = smov 40   ;;  %s144_s14 = smov 32   ;;  %v115_v13 = vld [vmem:[%s209_s0 + $0x3] sm:$0x1]   ;;  %v116_v14 = vld [vmem:[%s209_s0 + $0x2] sm:$0x1]  }
   0x8   :  { %s145_s19 = smov 24   ;;  %s146_s20 = smov 16   ;;  %v117_v15 = vld [vmem:[%s209_s0 + $0x1] sm:$0x1]   ;;  %vm27_vm4 = vcmask 851712   ;;  %vm33_vm5 = vcmask 786112  }
   0x9   :  { %s147_s0 = smov 8   ;;  %vm39_vm6 = vcmask 720512   ;;  %vm45_vm7 = vcmask 654912   ;;  %vm51_vm8 = vcmask 589312   ;;  %vm57_vm9 = vcmask 523712  }
   0xa   :  { %31 = vrot.lane.b32.xlu0 %v107_v4, %s137_s24  ;;  %37 = vrot.lane.b32.xlu1 %v108_v5, %s138_s25  ;;  %vm63_vm10 = vcmask 458112   ;;  %vm69_vm11 = vcmask 392512   ;;  %vm75_vm12 = vcmask 326912   ;;  %vm81_vm13 = vcmask 261312  }
   0xb   :  { %vm87_vm14 = vcmask 195712   ;;  %vm93_vm15 = vcmask 130112  }
   0xe   :  { %43 = vrot.lane.b32.xlu0 %v109_v7, %s139_s30  ;;  %49 = vrot.lane.b32.xlu1 %v110_v8, %s140_s2 }
  0x12   :  { %55 = vrot.lane.b32.xlu0 %v111_v9, %s141_s7  ;;  %61 = vrot.lane.b32.xlu1 %v112_v10, %s142_s8 }
  0x16   :  { %67 = vrot.lane.b32.xlu0 %v113_v11, %s143_s13  ;;  %73 = vrot.lane.b32.xlu1 %v114_v12, %s144_s14 }
  0x1a   :  { %79 = vrot.lane.b32.xlu0 %v115_v13, %s145_s19  ;;  %85 = vrot.lane.b32.xlu1 %v116_v14, %s146_s20 }
  0x1e   :  { %91 = vrot.lane.b32.xlu0 %v117_v15, %s147_s0 }
  0x74   :  { %v8_v16 = vpop.permute.xlu0 %7   ;;  %v20_v17 = vpop.permute.xlu1 %19  }
  0x75   :  { %10 = vst.msk [vmem:[#allocation0] sm:$0x1] %vm9_vm1, %v8_v16  }
  0x78   :  { %v14_v18 = vpop.permute.xlu0 %13   ;;  %v26_v19 = vpop.permute.xlu1 %25  }
  0x79   :  { %16 = vst.msk [vmem:[#allocation0] sm:$0x1] %vm15_vm2, %v14_v18  }
  0x7a   :  { %22 = vst.msk [vmem:[#allocation0] sm:$0x1] %vm21_vm3, %v20_v17  }
  0x7b   :  { %28 = vst.msk [vmem:[#allocation0] sm:$0x1] %vm27_vm4, %v26_v19  }
  0x7c   :  { %v32_v20 = vpop.permute.xlu0 %31   ;;  %v38_v21 = vpop.permute.xlu1 %37  }
  0x7d   :  { %34 = vst.msk [vmem:[#allocation0] sm:$0x1] %vm33_vm5, %v32_v20  }
  0x7e   :  { %40 = vst.msk [vmem:[#allocation0] sm:$0x1] %vm39_vm6, %v38_v21  }
  0x80   :  { %v44_v22 = vpop.permute.xlu0 %43   ;;  %v50_v23 = vpop.permute.xlu1 %49  }
  0x81   :  { %46 = vst.msk [vmem:[#allocation0] sm:$0x1] %vm45_vm7, %v44_v22  }
  0x82   :  { %52 = vst.msk [vmem:[#allocation0] sm:$0x1] %vm51_vm8, %v50_v23  }
  0x84   :  { %v56_v24 = vpop.permute.xlu0 %55   ;;  %v62_v25 = vpop.permute.xlu1 %61  }
  0x85   :  { %58 = vst.msk [vmem:[#allocation0] sm:$0x1] %vm57_vm9, %v56_v24  }
  0x86   :  { %64 = vst.msk [vmem:[#allocation0] sm:$0x1] %vm63_vm10, %v62_v25  }
  0x88   :  { %v68_v26 = vpop.permute.xlu0 %67   ;;  %v74_v27 = vpop.permute.xlu1 %73  }
  0x89   :  { %70 = vst.msk [vmem:[#allocation0] sm:$0x1] %vm69_vm11, %v68_v26  }
  0x8a   :  { %76 = vst.msk [vmem:[#allocation0] sm:$0x1] %vm75_vm12, %v74_v27  }
  0x8c   :  { %v80_v28 = vpop.permute.xlu0 %79   ;;  %v86_v29 = vpop.permute.xlu1 %85  }
  0x8d   :  { %82 = vst.msk [vmem:[#allocation0] sm:$0x1] %vm81_vm13, %v80_v28  }
  0x8e   :  { %88 = vst.msk [vmem:[#allocation0] sm:$0x1] %vm87_vm14, %v86_v29  }
  0x90   :  { %v92_v30 = vpop.permute.xlu0 %91  }
  0x91   :  { %94 = vst.msk [vmem:[#allocation0] sm:$0x1] %vm93_vm15, %v92_v30  }
  0x98   :  { %v99_v31 = vld [vmem:[#allocation0] sm:$0x1] }
  0x99   :  { %102 = vst [vmem:[%s210_s1] sm:$0x1] %v99_v31 }

// kernel: tile.8
= control target key start
LH: loop header
LB: loop body
LE: loop exit
PB: predicated region body
PF: predicated region fallthrough
CT: control target
= control target key end

     0   :  { %s28_s0 = inlined_call_operand.vmem [shape: f32[8], index: 0, kind: input, shape index: {}]   ;;  %s29_s1 = inlined_call_operand.vmem [shape: f32[16,8], index: 1, kind: output, shape index: {}]  }
   0x1   :  { %v4_v0 = vld [vmem:[%s28_s0] ss:$0 sm:$0xff] }
   0x2   :  { %5 = vst [vmem:[%s29_s1] sm:$0xff] %v4_v0  ;;  %8 = vst [vmem:[%s29_s1 + $0x8] sm:$0xff] %v4_v0 }

// kernel: down_block.3
= control target key start
LH: loop header
LB: loop body
LE: loop exit
PB: predicated region body
PF: predicated region fallthrough
CT: control target
= control target key end

     0   :  { %s754_s2 = inlined_call_operand.vmem [shape: bf16[512,128], index: 2, kind: input, shape index: {}]   ;;  %s755_s1 = inlined_call_operand.vmem [shape: bf16[32,512], index: 1, kind: input, shape index: {}]   ;;  %s756_s3 = inlined_call_operand.vmem [shape: f32[1,128], index: 3, kind: input, shape index: {}]   ;;  %s757_s0 = inlined_call_operand.<no memory space> [shape: f32[1], index: 0, kind: input, shape index: {}]   ;;  %s758_s4 = inlined_call_operand.vmem [shape: f32[32,128], index: 4, kind: output, shape index: {}]  }
   0x1   :  { %v547_v0 = vld [vmem:[%s754_s2 + $0x78] sm:$0xff]   ;;  %v551_v4 = vld [vmem:[%s754_s2 + $0x70] sm:$0xff]   ;;  %v555_v8 = vld [vmem:[%s754_s2 + $0x68] sm:$0xff]   ;;  %v433_v50 = vstv %s757_s0 }
   0x2   :  { %v548_v1 = vld [vmem:[%s754_s2 + $0xf8] sm:$0xff]   ;;  %491 = vmatprep.subr.bf16.mxu0 %v547_v0  ;;  %v552_v5 = vld [vmem:[%s754_s2 + $0xf0] sm:$0xff]   ;;  %v556_v9 = vld [vmem:[%s754_s2 + $0xe8] sm:$0xff]  }
   0x3   :  { %v549_v2 = vld [vmem:[%s754_s2 + $0x38] sm:$0xff]   ;;  %519 = vmatprep.subr.bf16.mxu1 %v548_v1  ;;  %v553_v6 = vld [vmem:[%s754_s2 + $0x30] sm:$0xff]   ;;  %v557_v10 = vld [vmem:[%s754_s2 + $0x28] sm:$0xff]  }
   0x4   :  { %v550_v3 = vld [vmem:[%s754_s2 + $0xb8] sm:$0xff]   ;;  %492 = vmatpush3.bf16.msra.mxu0 %v549_v2  ;;  %v554_v7 = vld [vmem:[%s754_s2 + $0xb0] sm:$0xff]   ;;  %v558_v11 = vld [vmem:[%s754_s2 + $0xa8] sm:$0xff]  }
   0x5   :  { %520 = vmatpush3.bf16.msra.mxu1 %v550_v3  ;;  %493 = vmatprep.subr.bf16.mxu0 %v551_v4  ;;  %v559_v12 = vld [vmem:[%s754_s2 + $0x60] sm:$0xff]   ;;  %v563_v16 = vld [vmem:[%s754_s2 + $0x58] sm:$0xff]   ;;  %v567_v20 = vld [vmem:[%s754_s2 + $0x50] sm:$0xff]  }
   0x6   :  { %521 = vmatprep.subr.bf16.mxu1 %v552_v5  ;;  %v560_v13 = vld [vmem:[%s754_s2 + $0xe0] sm:$0xff]   ;;  %v564_v17 = vld [vmem:[%s754_s2 + $0xd8] sm:$0xff]   ;;  %v568_v21 = vld [vmem:[%s754_s2 + $0xd0] sm:$0xff]  }
   0x7   :  { %v561_v14 = vld [vmem:[%s754_s2 + $0x20] sm:$0xff]   ;;  %v565_v18 = vld [vmem:[%s754_s2 + $0x18] sm:$0xff]   ;;  %v569_v22 = vld [vmem:[%s754_s2 + $0x10] sm:$0xff]  }
   0x8   :  { %494 = vmatpush3.bf16.msra.mxu0 %v553_v6  ;;  %v562_v15 = vld [vmem:[%s754_s2 + $0xa0] sm:$0xff]   ;;  %v566_v19 = vld [vmem:[%s754_s2 + $0x98] sm:$0xff]   ;;  %v570_v23 = vld [vmem:[%s754_s2 + $0x90] sm:$0xff]  }
   0x9   :  { %522 = vmatpush3.bf16.msra.mxu1 %v554_v7  ;;  %495 = vmatprep.subr.bf16.mxu0 %v555_v8  ;;  %v571_v24 = vld [vmem:[%s754_s2 + $0x48] sm:$0xff]   ;;  %v575_v28 = vld [vmem:[%s754_s2 + $0x40] sm:$0xff]  }
   0xa   :  { %523 = vmatprep.subr.bf16.mxu1 %v556_v9  ;;  %v572_v25 = vld [vmem:[%s754_s2 + $0xc8] sm:$0xff]   ;;  %v576_v29 = vld [vmem:[%s754_s2 + $0xc0] sm:$0xff]  }
   0xb   :  { %v573_v26 = vld [vmem:[%s754_s2 + $0x8] sm:$0xff]   ;;  %v577_v30 = vld [vmem:[%s754_s2] sm:$0xff]  }
   0xc   :  { %496 = vmatpush3.bf16.msra.mxu0 %v557_v10  ;;  %v574_v27 = vld [vmem:[%s754_s2 + $0x88] sm:$0xff]   ;;  %v578_v31 = vld [vmem:[%s754_s2 + $0x80] sm:$0xff]  }
   0xd   :  { %524 = vmatpush3.bf16.msra.mxu1 %v558_v11  ;;  %497 = vmatprep.subr.bf16.mxu0 %v559_v12  ;;  %v579_v32 = vld [vmem:[%s755_s1] ss:$16 sps:$4 sm:$0xff]   ;;  %v581_v33 = vld [vmem:[%s755_s1 + $0x4] ss:$16 sps:$4 sm:$0xff]   ;;  %v582_v34 = vld [vmem:[%s755_s1 + $0x8] ss:$16 sps:$4 sm:$0xff]  }
   0xe   :  { %525 = vmatprep.subr.bf16.mxu1 %v560_v13  ;;  %v584_v35 = vld [vmem:[%s755_s1 + $0xc] ss:$16 sps:$4 sm:$0xff]   ;;  %362 = vmatprep.mubr.bf16.mxu0 %v581_v33  ;;  %v585_v36 = vld [vmem:[%s755_s1 + $0x24] ss:$16 sps:$4 sm:$0xff]   ;;  %v589_v38 = vld [vmem:[%s755_s1 + $0x20] ss:$16 sps:$4 sm:$0xff]  }
   0xf   :  { %411 = vmatprep.mubr.bf16.mxu1 %v584_v35  ;;  %v587_v37 = vld [vmem:[%s755_s1 + $0x2c] ss:$16 sps:$4 sm:$0xff]   ;;  %v590_v39 = vld [vmem:[%s755_s1 + $0x28] ss:$16 sps:$4 sm:$0xff]   ;;  %v450_v42 = vld [vmem:[%s756_s3] ss:$0 sm:$0xff] }
  0x10   :  { %498 = vmatpush3.bf16.msra.mxu0 %v561_v14 }
  0x11   :  { %526 = vmatpush3.bf16.msra.mxu1 %v562_v15  ;;  %499 = vmatprep.subr.bf16.mxu0 %v563_v16 }
  0x12   :  { %527 = vmatprep.subr.bf16.mxu1 %v564_v17 }
  0x14   :  { %500 = vmatpush3.bf16.msra.mxu0 %v565_v18 }
  0x15   :  { %528 = vmatpush3.bf16.msra.mxu1 %v566_v19  ;;  %501 = vmatprep.subr.bf16.mxu0 %v567_v20 }
  0x16   :  { %529 = vmatprep.subr.bf16.mxu1 %v568_v21 }
  0x18   :  { %502 = vmatpush3.bf16.msra.mxu0 %v569_v22 }
  0x19   :  { %530 = vmatpush3.bf16.msra.mxu1 %v570_v23  ;;  %503 = vmatprep.subr.bf16.mxu0 %v571_v24 }
  0x1a   :  { %531 = vmatprep.subr.bf16.mxu1 %v572_v25 }
  0x1c   :  { %504 = vmatpush3.bf16.msra.mxu0 %v573_v26 }
  0x1d   :  { %532 = vmatpush3.bf16.msra.mxu1 %v574_v27  ;;  %505 = vmatprep.subr.bf16.mxu0 %v575_v28 }
  0x1e   :  { %533 = vmatprep.subr.bf16.mxu1 %v576_v29 }
  0x20   :  { %506 = vmatpush3.bf16.msra.mxu0 %v577_v30 }
  0x21   :  { %534 = vmatpush3.bf16.msra.mxu1 %v578_v31 }
  0x23   :  { %363 = vmatmul.mubr.bf16.vlgmr.msra.gmra.mxu0 %v579_v32 }
  0x24   :  { %412 = vmatmul.mubr.bf16.vlgmr.msra.gmra.mxu1 %v582_v34  ;;  %370 = vmatprep.mubr.bf16.mxu0 %v585_v36 }
  0x25   :  { %419 = vmatprep.mubr.bf16.mxu1 %v587_v37 }
  0x2b   :  { %371 = vmatmul.mubr.bf16.gmra.mxu0 %v589_v38 }
  0x2c   :  { %420 = vmatmul.mubr.bf16.gmra.mxu1 %v590_v39 }
  0xe3   :  { %v507_v40 = vpop.f32.mrf.mxu0 }
  0xe4   :  { %v535_v41 = vpop.f32.mrf.mxu1 }
  0xe5   :  { %v508_v43 = vpop.f32.mrf.mxu0 }
  0xe6   :  { %v509_v44 = vadd.f32 %v508_v43, %v507_v40  ;;  %v536_v45 = vpop.f32.mrf.mxu1 }
  0xe7   :  { %v510_v46 = vpop.f32.mrf.mxu0  ;;  %v537_v48 = vadd.f32 %v536_v45, %v535_v41 }
  0xe8   :  { %v365_v47 = vadd.f32 %v509_v44, %v450_v42  ;;  %v538_v49 = vpop.f32.mrf.mxu1 }
  0xe9   :  { %v511_v51 = vpop.f32.mrf.mxu0 }
  0xea   :  { %v414_v52 = vadd.f32 %v537_v48, %v365_v47  ;;  %v512_v53 = vadd.f32 %v511_v51, %v510_v46  ;;  %v539_v54 = vpop.f32.mrf.mxu1 }
  0xeb   :  { %v513_v55 = vpop.f32.mrf.mxu0  ;;  %v540_v58 = vadd.f32 %v539_v54, %v538_v49 }
  0xec   :  { %vm429_vm0 = vcmp.ge.f32.partialorder %v414_v52, 0.0  ;;  %v434_v56 = vmul.f32 %v433_v50, %v414_v52  ;;  %v368_v57 = vadd.f32 %v512_v53, %v450_v42  ;;  %v541_v59 = vpop.f32.mrf.mxu1 }
  0xed   :  { %v514_v60 = vpop.f32.mrf.mxu0 }
  0xee   :  { %v438_v61 = vsel %vm429_vm0, %v414_v52, %v434_v56  ;;  %v417_v62 = vadd.f32 %v540_v58, %v368_v57  ;;  %v515_v63 = vadd.f32 %v514_v60, %v513_v55  ;;  %v542_v0 = vpop.f32.mrf.mxu1 }
  0xef   :  { %442 = vst [vmem:[%s758_s4] sm:$0xff] %v438_v61  ;;  %v516_v1 = vpop.f32.mrf.mxu0  ;;  %v543_v4 = vadd.f32 %v542_v0, %v541_v59 }
  0xf0   :  { %vm430_vm1 = vcmp.ge.f32.partialorder %v417_v62, 0.0  ;;  %v435_v2 = vmul.f32 %v433_v50, %v417_v62  ;;  %v373_v3 = vadd.f32 %v515_v63, %v450_v42  ;;  %v544_v5 = vpop.f32.mrf.mxu1 }
  0xf1   :  { %v517_v6 = vpop.f32.mrf.mxu0 }
  0xf2   :  { %v439_v7 = vsel %vm430_vm1, %v417_v62, %v435_v2  ;;  %v422_v8 = vadd.f32 %v543_v4, %v373_v3  ;;  %v518_v9 = vadd.f32 %v517_v6, %v516_v1  ;;  %v545_v10 = vpop.f32.mrf.mxu1 }
  0xf3   :  { %443 = vst [vmem:[%s758_s4 + $0x8] sm:$0xff] %v439_v7  ;;  %v546_v13 = vadd.f32 %v545_v10, %v544_v5 }
  0xf4   :  { %vm431_vm2 = vcmp.ge.f32.partialorder %v422_v8, 0.0  ;;  %v436_v11 = vmul.f32 %v433_v50, %v422_v8  ;;  %v376_v12 = vadd.f32 %v518_v9, %v450_v42 }
  0xf6   :  { %v440_v14 = vsel %vm431_vm2, %v422_v8, %v436_v11  ;;  %v425_v15 = vadd.f32 %v546_v13, %v376_v12 }
  0xf7   :  { %444 = vst [vmem:[%s758_s4 + $0x10] sm:$0xff] %v440_v14 }
  0xf8   :  { %vm432_vm3 = vcmp.ge.f32.partialorder %v425_v15, 0.0  ;;  %v437_v16 = vmul.f32 %v433_v50, %v425_v15 }
  0xfa   :  { %v441_v17 = vsel %vm432_vm3, %v425_v15, %v437_v16 }
  0xfb   :  { %445 = vst [vmem:[%s758_s4 + $0x18] sm:$0xff] %v441_v17 }

// kernel: down_block.4
= control target key start
LH: loop header
LB: loop body
LE: loop exit
PB: predicated region body
PF: predicated region fallthrough
CT: control target
= control target key end

     0   :  { %s301_s2 = inlined_call_operand.vmem [shape: bf16[128,128], index: 2, kind: input, shape index: {}]   ;;  %s302_s1 = inlined_call_operand.vmem [shape: bf16[32,128], index: 1, kind: input, shape index: {}]   ;;  %s303_s3 = inlined_call_operand.vmem [shape: f32[1,128], index: 3, kind: input, shape index: {}]   ;;  %s304_s0 = inlined_call_operand.<no memory space> [shape: f32[1], index: 0, kind: input, shape index: {}]   ;;  %s305_s4 = inlined_call_operand.vmem [shape: f32[32,128], index: 4, kind: output, shape index: {}]  }
   0x1   :  { %v218_v0 = vld [vmem:[%s301_s2 + $0x38] sm:$0xff]   ;;  %v219_v1 = vld [vmem:[%s301_s2 + $0x30] sm:$0xff]   ;;  %v220_v2 = vld [vmem:[%s301_s2 + $0x28] sm:$0xff]   ;;  %v160_v12 = vstv %s304_s0 }
   0x2   :  { %198 = vmatprep.subr.bf16.mxu0 %v218_v0  ;;  %v221_v3 = vld [vmem:[%s301_s2 + $0x20] sm:$0xff]   ;;  %v222_v5 = vld [vmem:[%s301_s2 + $0x18] sm:$0xff]   ;;  %v223_v6 = vld [vmem:[%s301_s2 + $0x10] sm:$0xff]  }
   0x3   :  { %199 = vmatpush3.bf16.msra.mxu0 %v218_v0  ;;  %v226_v4 = vld [vmem:[%s302_s1] sm:$0xff]   ;;  %v224_v7 = vld [vmem:[%s301_s2 + $0x8] sm:$0xff]  }
   0x4   :  { %200 = vmatprep.subr.bf16.mxu0 %v219_v1  ;;  %214 = vmatprep.mubr.bf16.mxu0 %v226_v4  ;;  %v225_v8 = vld [vmem:[%s301_s2] sm:$0xff]   ;;  %v227_v9 = vld [vmem:[%s302_s1 + $0x8] sm:$0xff]  }
   0x5   :  { %v177_v10 = vld [vmem:[%s303_s3] ss:$0 sm:$0xff] }
   0x7   :  { %201 = vmatpush3.bf16.msra.mxu0 %v219_v1 }
   0x8   :  { %202 = vmatprep.subr.bf16.mxu0 %v220_v2 }
   0xb   :  { %203 = vmatpush3.bf16.msra.mxu0 %v220_v2 }
   0xc   :  { %204 = vmatprep.subr.bf16.mxu0 %v221_v3 }
   0xf   :  { %205 = vmatpush3.bf16.msra.mxu0 %v221_v3 }
  0x10   :  { %206 = vmatprep.subr.bf16.mxu0 %v222_v5 }
  0x13   :  { %207 = vmatpush3.bf16.msra.mxu0 %v222_v5 }
  0x14   :  { %208 = vmatprep.subr.bf16.mxu0 %v223_v6 }
  0x17   :  { %209 = vmatpush3.bf16.msra.mxu0 %v223_v6 }
  0x18   :  { %210 = vmatprep.subr.bf16.mxu0 %v224_v7 }
  0x1b   :  { %211 = vmatpush3.bf16.msra.mxu0 %v224_v7 }
  0x1c   :  { %212 = vmatprep.subr.bf16.mxu0 %v225_v8 }
  0x1f   :  { %213 = vmatpush3.bf16.msra.mxu0 %v225_v8 }
  0x22   :  { %215 = vmatmul.mubr.bf16.vlgmr.msra.gmra.mxu0 %v227_v9 }
  0xe2   :  { %v216_v11 = vpop.f32.mrf.mxu0 }
  0xe3   :  { %v149_v13 = vadd.f32 %v216_v11, %v177_v10 }
  0xe4   :  { %v140_v14 = vpop.f32.mrf.mxu0 }
  0xe5   :  { %vm158_vm0 = vcmp.ge.f32.partialorder %v149_v13, 0.0  ;;  %v163_v15 = vmul.f32 %v160_v12, %v149_v13  ;;  %v141_v16 = vadd.f32 %v177_v10, %v140_v14 }
  0xe6   :  { %v217_v17 = vpop.f32.mrf.mxu0 }
  0xe7   :  { %v167_v18 = vsel %vm158_vm0, %v149_v13, %v163_v15  ;;  %vm156_vm1 = vcmp.ge.f32.partialorder %v141_v16, 0.0  ;;  %v161_v19 = vmul.f32 %v160_v12, %v141_v16  ;;  %v152_v20 = vadd.f32 %v217_v17, %v177_v10 }
  0xe8   :  { %171 = vst [vmem:[%s305_s4 + $0x10] sm:$0xff] %v167_v18  ;;  %v143_v21 = vpop.f32.mrf.mxu0 }
  0xe9   :  { %v165_v22 = vsel %vm156_vm1, %v141_v16, %v161_v19  ;;  %vm159_vm2 = vcmp.ge.f32.partialorder %v152_v20, 0.0  ;;  %v164_v23 = vmul.f32 %v160_v12, %v152_v20  ;;  %v144_v24 = vadd.f32 %v177_v10, %v143_v21 }
  0xea   :  { %169 = vst [vmem:[%s305_s4] sm:$0xff] %v165_v22 }
  0xeb   :  { %v168_v25 = vsel %vm159_vm2, %v152_v20, %v164_v23  ;;  %vm157_vm3 = vcmp.ge.f32.partialorder %v144_v24, 0.0  ;;  %v162_v26 = vmul.f32 %v160_v12, %v144_v24 }
  0xec   :  { %172 = vst [vmem:[%s305_s4 + $0x18] sm:$0xff] %v168_v25 }
  0xed   :  { %v166_v27 = vsel %vm157_vm3, %v144_v24, %v162_v26 }
  0xee   :  { %170 = vst [vmem:[%s305_s4 + $0x8] sm:$0xff] %v166_v27 }

// kernel: sub.1
= control target key start
LH: loop header
LB: loop body
LE: loop exit
PB: predicated region body
PF: predicated region fallthrough
CT: control target
= control target key end

     0   :  { %v894_v12 = vmov 0.0   ;;  %s1550_s0 = inlined_call_operand.vmem [shape: f32[2,8,16,16], index: 0, kind: input, shape index: {}]   ;;  %s1551_s1 = inlined_call_operand.vmem [shape: f32[2,8,16,16], index: 1, kind: input, shape index: {}]   ;;  %s1552_s2 = inlined_call_operand.vmem [shape: bf16[2,8,16,16], index: 2, kind: output, shape index: {}]  }
   0x1   :  { %v3_v0 = vld [vmem:[%s1550_s0] sm:$0xff]  ;;  %v707_v5 = vld [vmem:[%s1550_s0 + $0x10] sm:$0xff] }
   0x2   :  { %v4_v1 = vld [vmem:[%s1551_s1] sm:$0xff]  ;;  %v708_v6 = vld [vmem:[%s1551_s1 + $0x10] sm:$0xff] }
   0x3   :  { %v704_v2 = vld [vmem:[%s1550_s0 + $0x100] sm:$0xff]  ;;  %v7_v3 = vsub.f32 %v3_v0, %v4_v1  ;;  %v28_v8 = vsub.f32 %v707_v5, %v708_v6  ;;  %v710_v9 = vld [vmem:[%s1550_s0 + $0x110] sm:$0xff] }
   0x4   :  { %v705_v4 = vld [vmem:[%s1551_s1 + $0x100] sm:$0xff]  ;;  %v711_v10 = vld [vmem:[%s1551_s1 + $0x110] sm:$0xff] }
   0x5   :  { %v17_v7 = vsub.f32 %v704_v2, %v705_v4  ;;  %v713_v11 = vld [vmem:[%s1550_s0 + $0x20] sm:$0xff]  ;;  %v9_v13 = vpack.c.bf16 %v894_v12, %v7_v3  ;;  %v39_v14 = vsub.f32 %v710_v9, %v711_v10  ;;  %v31_v19 = vpack.c.bf16 %v894_v12, %v28_v8  ;;  %v719_v22 = vld [vmem:[%s1550_s0 + $0x30] sm:$0xff] }
   0x6   :  { %v714_v15 = vld [vmem:[%s1551_s1 + $0x20] sm:$0xff]  ;;  %v720_v23 = vld [vmem:[%s1551_s1 + $0x30] sm:$0xff] }
   0x7   :  { %v716_v16 = vld [vmem:[%s1550_s0 + $0x120] sm:$0xff]  ;;  %v20_v18 = vpack.c.bf16 %v894_v12, %v17_v7  ;;  %v50_v20 = vsub.f32 %v713_v11, %v714_v15  ;;  %v722_v24 = vld [vmem:[%s1550_s0 + $0x130] sm:$0xff]  ;;  %10 = vst [vmem:[%s1552_s2] sm:$0xf] %v9_v13  ;;  %v42_v25 = vpack.c.bf16 %v894_v12, %v39_v14  ;;  %v72_v26 = vsub.f32 %v719_v22, %v720_v23 }
   0x8   :  { %v717_v17 = vld [vmem:[%s1551_s1 + $0x120] sm:$0xff]  ;;  %v723_v27 = vld [vmem:[%s1551_s1 + $0x130] sm:$0xff]  ;;  %709 = vst [vmem:[%s1552_s2 + $0x8] sm:$0xf] %v31_v19 }
   0x9   :  { %v61_v21 = vsub.f32 %v716_v16, %v717_v17  ;;  %v725_v28 = vld [vmem:[%s1550_s0 + $0x40] sm:$0xff]  ;;  %706 = vst [vmem:[%s1552_s2 + $0x80] sm:$0xf] %v20_v18  ;;  %v53_v30 = vpack.c.bf16 %v894_v12, %v50_v20  ;;  %v83_v32 = vsub.f32 %v722_v24, %v723_v27  ;;  %v731_v36 = vld [vmem:[%s1550_s0 + $0x50] sm:$0xff]  ;;  %712 = vst [vmem:[%s1552_s2 + $0x88] sm:$0xf] %v42_v25 }
   0xa   :  { %v726_v29 = vld [vmem:[%s1551_s1 + $0x40] sm:$0xff]  ;;  %v75_v37 = vpack.c.bf16 %v894_v12, %v72_v26  ;;  %v732_v39 = vld [vmem:[%s1551_s1 + $0x50] sm:$0xff] }
   0xb   :  { %v64_v31 = vpack.c.bf16 %v894_v12, %v61_v21  ;;  %v94_v33 = vsub.f32 %v725_v28, %v726_v29  ;;  %v728_v34 = vld [vmem:[%s1550_s0 + $0x140] sm:$0xff]  ;;  %v734_v40 = vld [vmem:[%s1550_s0 + $0x150] sm:$0xff]  ;;  %715 = vst [vmem:[%s1552_s2 + $0x10] sm:$0xf] %v53_v30  ;;  %v86_v42 = vpack.c.bf16 %v894_v12, %v83_v32  ;;  %v116_v44 = vsub.f32 %v731_v36, %v732_v39 }
   0xc   :  { %v729_v35 = vld [vmem:[%s1551_s1 + $0x140] sm:$0xff]  ;;  %v735_v41 = vld [vmem:[%s1551_s1 + $0x150] sm:$0xff]  ;;  %721 = vst [vmem:[%s1552_s2 + $0x18] sm:$0xf] %v75_v37 }
   0xd   :  { %v105_v38 = vsub.f32 %v728_v34, %v729_v35  ;;  %718 = vst [vmem:[%s1552_s2 + $0x90] sm:$0xf] %v64_v31  ;;  %v97_v43 = vpack.c.bf16 %v894_v12, %v94_v33  ;;  %v127_v45 = vsub.f32 %v734_v40, %v735_v41  ;;  %v737_v46 = vld [vmem:[%s1550_s0 + $0x60] sm:$0xff]  ;;  %v743_v52 = vld [vmem:[%s1550_s0 + $0x70] sm:$0xff]  ;;  %724 = vst [vmem:[%s1552_s2 + $0x98] sm:$0xf] %v86_v42 }
   0xe   :  { %v738_v47 = vld [vmem:[%s1551_s1 + $0x60] sm:$0xff]  ;;  %v744_v53 = vld [vmem:[%s1551_s1 + $0x70] sm:$0xff]  ;;  %v119_v54 = vpack.c.bf16 %v894_v12, %v116_v44 }
   0xf   :  { %v740_v48 = vld [vmem:[%s1550_s0 + $0x160] sm:$0xff]  ;;  %v108_v49 = vpack.c.bf16 %v894_v12, %v105_v38  ;;  %v138_v50 = vsub.f32 %v737_v46, %v738_v47  ;;  %727 = vst [vmem:[%s1552_s2 + $0x20] sm:$0xf] %v97_v43  ;;  %v130_v55 = vpack.c.bf16 %v894_v12, %v127_v45  ;;  %v160_v57 = vsub.f32 %v743_v52, %v744_v53  ;;  %v746_v58 = vld [vmem:[%s1550_s0 + $0x170] sm:$0xff] }
  0x10   :  { %v741_v51 = vld [vmem:[%s1551_s1 + $0x160] sm:$0xff]  ;;  %v747_v59 = vld [vmem:[%s1551_s1 + $0x170] sm:$0xff]  ;;  %733 = vst [vmem:[%s1552_s2 + $0x28] sm:$0xf] %v119_v54 }
  0x11   :  { %v149_v56 = vsub.f32 %v740_v48, %v741_v51  ;;  %v749_v60 = vld [vmem:[%s1550_s0 + $0x80] sm:$0xff]  ;;  %730 = vst [vmem:[%s1552_s2 + $0xa0] sm:$0xf] %v108_v49  ;;  %v141_v61 = vpack.c.bf16 %v894_v12, %v138_v50  ;;  %v171_v62 = vsub.f32 %v746_v58, %v747_v59  ;;  %736 = vst [vmem:[%s1552_s2 + $0xa8] sm:$0xf] %v130_v55  ;;  %v755_v6 = vld [vmem:[%s1550_s0 + $0x90] sm:$0xff] }
  0x12   :  { %v750_v63 = vld [vmem:[%s1551_s1 + $0x80] sm:$0xff]  ;;  %v163_v3 = vpack.c.bf16 %v894_v12, %v160_v57  ;;  %v756_v7 = vld [vmem:[%s1551_s1 + $0x90] sm:$0xff] }
  0x13   :  { %v752_v0 = vld [vmem:[%s1550_s0 + $0x180] sm:$0xff]  ;;  %v152_v2 = vpack.c.bf16 %v894_v12, %v149_v56  ;;  %v182_v4 = vsub.f32 %v749_v60, %v750_v63  ;;  %v758_v8 = vld [vmem:[%s1550_s0 + $0x190] sm:$0xff]  ;;  %739 = vst [vmem:[%s1552_s2 + $0x30] sm:$0xf] %v141_v61  ;;  %v174_v9 = vpack.c.bf16 %v894_v12, %v171_v62  ;;  %v204_v10 = vsub.f32 %v755_v6, %v756_v7  ;;  %v797_v61 = vld [vmem:[%s1550_s0 + $0x8] sm:$0xff] }
  0x14   :  { %v753_v1 = vld [vmem:[%s1551_s1 + $0x180] sm:$0xff]  ;;  %v759_v11 = vld [vmem:[%s1551_s1 + $0x190] sm:$0xff]  ;;  %745 = vst [vmem:[%s1552_s2 + $0x38] sm:$0xf] %v163_v3  ;;  %v798_v62 = vld [vmem:[%s1551_s1 + $0x8] sm:$0xff] }
  0x15   :  { %v193_v5 = vsub.f32 %v752_v0, %v753_v1  ;;  %v761_v13 = vld [vmem:[%s1550_s0 + $0xa0] sm:$0xff]  ;;  %742 = vst [vmem:[%s1552_s2 + $0xb0] sm:$0xf] %v152_v2  ;;  %v185_v15 = vpack.c.bf16 %v894_v12, %v182_v4  ;;  %v215_v17 = vsub.f32 %v758_v8, %v759_v11  ;;  %v767_v21 = vld [vmem:[%s1550_s0 + $0xb0] sm:$0xff]  ;;  %748 = vst [vmem:[%s1552_s2 + $0xb8] sm:$0xf] %v174_v9 }
  0x16   :  { %v762_v14 = vld [vmem:[%s1551_s1 + $0xa0] sm:$0xff]  ;;  %v207_v22 = vpack.c.bf16 %v894_v12, %v204_v10  ;;  %v768_v24 = vld [vmem:[%s1551_s1 + $0xb0] sm:$0xff]  ;;  %v358_v2 = vsub.f32 %v797_v61, %v798_v62  ;;  %v800_v3 = vld [vmem:[%s1550_s0 + $0x108] sm:$0xff] }
  0x17   :  { %v196_v16 = vpack.c.bf16 %v894_v12, %v193_v5  ;;  %v226_v18 = vsub.f32 %v761_v13, %v762_v14  ;;  %v764_v19 = vld [vmem:[%s1550_s0 + $0x1a0] sm:$0xff]  ;;  %v770_v25 = vld [vmem:[%s1550_s0 + $0x1b0] sm:$0xff]  ;;  %751 = vst [vmem:[%s1552_s2 + $0x40] sm:$0xf] %v185_v15  ;;  %v218_v27 = vpack.c.bf16 %v894_v12, %v215_v17  ;;  %v248_v29 = vsub.f32 %v767_v21, %v768_v24  ;;  %v801_v4 = vld [vmem:[%s1551_s1 + $0x108] sm:$0xff] }
  0x18   :  { %v765_v20 = vld [vmem:[%s1551_s1 + $0x1a0] sm:$0xff]  ;;  %v771_v26 = vld [vmem:[%s1551_s1 + $0x1b0] sm:$0xff]  ;;  %757 = vst [vmem:[%s1552_s2 + $0x48] sm:$0xf] %v207_v22  ;;  %v803_v5 = vld [vmem:[%s1550_s0 + $0x18] sm:$0xff]  ;;  %v369_v7 = vsub.f32 %v800_v3, %v801_v4  ;;  %v361_v13 = vpack.c.bf16 %v894_v12, %v358_v2 }
  0x19   :  { %v237_v23 = vsub.f32 %v764_v19, %v765_v20  ;;  %754 = vst [vmem:[%s1552_s2 + $0xc0] sm:$0xf] %v196_v16  ;;  %v229_v28 = vpack.c.bf16 %v894_v12, %v226_v18  ;;  %v259_v30 = vsub.f32 %v770_v25, %v771_v26  ;;  %v773_v31 = vld [vmem:[%s1550_s0 + $0xc0] sm:$0xff]  ;;  %v779_v37 = vld [vmem:[%s1550_s0 + $0xd0] sm:$0xff]  ;;  %760 = vst [vmem:[%s1552_s2 + $0xc8] sm:$0xf] %v218_v27 }
  0x1a   :  { %v774_v32 = vld [vmem:[%s1551_s1 + $0xc0] sm:$0xff]  ;;  %v780_v38 = vld [vmem:[%s1551_s1 + $0xd0] sm:$0xff]  ;;  %v251_v39 = vpack.c.bf16 %v894_v12, %v248_v29  ;;  %v804_v8 = vld [vmem:[%s1551_s1 + $0x18] sm:$0xff]  ;;  %v372_v19 = vpack.c.bf16 %v894_v12, %v369_v7  ;;  %799 = vst [vmem:[%s1552_s2 + $0x4] sm:$0xf] %v361_v13 }
  0x1b   :  { %v776_v33 = vld [vmem:[%s1550_s0 + $0x1c0] sm:$0xff]  ;;  %v240_v34 = vpack.c.bf16 %v894_v12, %v237_v23  ;;  %v270_v35 = vsub.f32 %v773_v31, %v774_v32  ;;  %763 = vst [vmem:[%s1552_s2 + $0x50] sm:$0xf] %v229_v28  ;;  %v262_v40 = vpack.c.bf16 %v894_v12, %v259_v30  ;;  %v292_v42 = vsub.f32 %v779_v37, %v780_v38  ;;  %v782_v43 = vld [vmem:[%s1550_s0 + $0x1d0] sm:$0xff]  ;;  %v806_v9 = vld [vmem:[%s1550_s0 + $0x118] sm:$0xff] }
  0x1c   :  { %v777_v36 = vld [vmem:[%s1551_s1 + $0x1c0] sm:$0xff]  ;;  %v783_v44 = vld [vmem:[%s1551_s1 + $0x1d0] sm:$0xff]  ;;  %769 = vst [vmem:[%s1552_s2 + $0x58] sm:$0xf] %v251_v39  ;;  %v807_v10 = vld [vmem:[%s1551_s1 + $0x118] sm:$0xff]  ;;  %v380_v14 = vsub.f32 %v803_v5, %v804_v8 }
  0x1d   :  { %v281_v41 = vsub.f32 %v776_v33, %v777_v36  ;;  %v785_v45 = vld [vmem:[%s1550_s0 + $0xe0] sm:$0xff]  ;;  %766 = vst [vmem:[%s1552_s2 + $0xd0] sm:$0xf] %v240_v34  ;;  %v273_v46 = vpack.c.bf16 %v894_v12, %v270_v35  ;;  %v303_v47 = vsub.f32 %v782_v43, %v783_v44  ;;  %772 = vst [vmem:[%s1552_s2 + $0xd8] sm:$0xf] %v262_v40  ;;  %v791_v55 = vld [vmem:[%s1550_s0 + $0xf0] sm:$0xff] }
  0x1e   :  { %v786_v48 = vld [vmem:[%s1551_s1 + $0xe0] sm:$0xff]  ;;  %v295_v52 = vpack.c.bf16 %v894_v12, %v292_v42  ;;  %v792_v56 = vld [vmem:[%s1551_s1 + $0xf0] sm:$0xff]  ;;  %v391_v15 = vsub.f32 %v806_v9, %v807_v10  ;;  %v809_v16 = vld [vmem:[%s1550_s0 + $0x28] sm:$0xff]  ;;  %v383_v24 = vpack.c.bf16 %v894_v12, %v380_v14  ;;  %802 = vst [vmem:[%s1552_s2 + $0x84] sm:$0xf] %v372_v19 }
  0x1f   :  { %v788_v49 = vld [vmem:[%s1550_s0 + $0x1e0] sm:$0xff]  ;;  %v284_v51 = vpack.c.bf16 %v894_v12, %v281_v41  ;;  %v314_v53 = vsub.f32 %v785_v45, %v786_v48  ;;  %v794_v57 = vld [vmem:[%s1550_s0 + $0x1f0] sm:$0xff]  ;;  %775 = vst [vmem:[%s1552_s2 + $0x60] sm:$0xf] %v273_v46  ;;  %v306_v58 = vpack.c.bf16 %v894_v12, %v303_v47  ;;  %v336_v59 = vsub.f32 %v791_v55, %v792_v56  ;;  %v810_v17 = vld [vmem:[%s1551_s1 + $0x28] sm:$0xff] }
  0x20   :  { %v789_v50 = vld [vmem:[%s1551_s1 + $0x1e0] sm:$0xff]  ;;  %v795_v60 = vld [vmem:[%s1551_s1 + $0x1f0] sm:$0xff]  ;;  %781 = vst [vmem:[%s1552_s2 + $0x68] sm:$0xf] %v295_v52  ;;  %v812_v18 = vld [vmem:[%s1550_s0 + $0x128] sm:$0xff]  ;;  %v402_v20 = vsub.f32 %v809_v16, %v810_v17  ;;  %v394_v25 = vpack.c.bf16 %v894_v12, %v391_v15 }
  0x21   :  { %v325_v54 = vsub.f32 %v788_v49, %v789_v50  ;;  %778 = vst [vmem:[%s1552_s2 + $0xe0] sm:$0xf] %v284_v51  ;;  %v317_v63 = vpack.c.bf16 %v894_v12, %v314_v53  ;;  %v347_v1 = vsub.f32 %v794_v57, %v795_v60  ;;  %784 = vst [vmem:[%s1552_s2 + $0xe8] sm:$0xf] %v306_v58  ;;  %v813_v21 = vld [vmem:[%s1551_s1 + $0x128] sm:$0xff]  ;;  %v815_v22 = vld [vmem:[%s1550_s0 + $0x38] sm:$0xff] }
  0x22   :  { %v339_v6 = vpack.c.bf16 %v894_v12, %v336_v59  ;;  %v816_v23 = vld [vmem:[%s1551_s1 + $0x38] sm:$0xff]  ;;  %v413_v26 = vsub.f32 %v812_v18, %v813_v21  ;;  %v821_v30 = vld [vmem:[%s1550_s0 + $0x48] sm:$0xff]  ;;  %v405_v31 = vpack.c.bf16 %v894_v12, %v402_v20  ;;  %805 = vst [vmem:[%s1552_s2 + $0xc] sm:$0xf] %v383_v24  ;;  %808 = vst [vmem:[%s1552_s2 + $0x8c] sm:$0xf] %v394_v25 }
  0x23   :  { %v328_v0 = vpack.c.bf16 %v894_v12, %v325_v54  ;;  %787 = vst [vmem:[%s1552_s2 + $0x70] sm:$0xf] %v317_v63  ;;  %v350_v11 = vpack.c.bf16 %v894_v12, %v347_v1  ;;  %v424_v27 = vsub.f32 %v815_v22, %v816_v23  ;;  %v818_v28 = vld [vmem:[%s1550_s0 + $0x138] sm:$0xff]  ;;  %v822_v33 = vld [vmem:[%s1551_s1 + $0x48] sm:$0xff] }
  0x24   :  { %793 = vst [vmem:[%s1552_s2 + $0x78] sm:$0xf] %v339_v6  ;;  %v819_v29 = vld [vmem:[%s1551_s1 + $0x138] sm:$0xff]  ;;  %v824_v34 = vld [vmem:[%s1550_s0 + $0x148] sm:$0xff]  ;;  %v416_v36 = vpack.c.bf16 %v894_v12, %v413_v26  ;;  %v446_v38 = vsub.f32 %v821_v30, %v822_v33  ;;  %811 = vst [vmem:[%s1552_s2 + $0x14] sm:$0xf] %v405_v31 }
  0x25   :  { %790 = vst [vmem:[%s1552_s2 + $0xf0] sm:$0xf] %v328_v0  ;;  %796 = vst [vmem:[%s1552_s2 + $0xf8] sm:$0xf] %v350_v11  ;;  %v435_v32 = vsub.f32 %v818_v28, %v819_v29  ;;  %v825_v35 = vld [vmem:[%s1551_s1 + $0x148] sm:$0xff]  ;;  %v427_v37 = vpack.c.bf16 %v894_v12, %v424_v27  ;;  %v827_v40 = vld [vmem:[%s1550_s0 + $0x58] sm:$0xff] }
  0x26   :  { %v457_v39 = vsub.f32 %v824_v34, %v825_v35  ;;  %v828_v41 = vld [vmem:[%s1551_s1 + $0x58] sm:$0xff]  ;;  %v833_v46 = vld [vmem:[%s1550_s0 + $0x68] sm:$0xff]  ;;  %814 = vst [vmem:[%s1552_s2 + $0x94] sm:$0xf] %v416_v36  ;;  %v449_v48 = vpack.c.bf16 %v894_v12, %v446_v38 }
  0x27   :  { %v830_v42 = vld [vmem:[%s1550_s0 + $0x158] sm:$0xff]  ;;  %v438_v43 = vpack.c.bf16 %v894_v12, %v435_v32  ;;  %v468_v44 = vsub.f32 %v827_v40, %v828_v41  ;;  %v834_v47 = vld [vmem:[%s1551_s1 + $0x68] sm:$0xff]  ;;  %817 = vst [vmem:[%s1552_s2 + $0x1c] sm:$0xf] %v427_v37 }
  0x28   :  { %v831_v45 = vld [vmem:[%s1551_s1 + $0x158] sm:$0xff]  ;;  %v460_v49 = vpack.c.bf16 %v894_v12, %v457_v39  ;;  %v490_v51 = vsub.f32 %v833_v46, %v834_v47  ;;  %v836_v52 = vld [vmem:[%s1550_s0 + $0x168] sm:$0xff]  ;;  %823 = vst [vmem:[%s1552_s2 + $0x24] sm:$0xf] %v449_v48 }
  0x29   :  { %v479_v50 = vsub.f32 %v830_v42, %v831_v45  ;;  %v837_v53 = vld [vmem:[%s1551_s1 + $0x168] sm:$0xff]  ;;  %v839_v54 = vld [vmem:[%s1550_s0 + $0x78] sm:$0xff]  ;;  %820 = vst [vmem:[%s1552_s2 + $0x9c] sm:$0xf] %v438_v43  ;;  %v471_v55 = vpack.c.bf16 %v894_v12, %v468_v44 }
  0x2a   :  { %v501_v56 = vsub.f32 %v836_v52, %v837_v53  ;;  %v840_v57 = vld [vmem:[%s1551_s1 + $0x78] sm:$0xff]  ;;  %826 = vst [vmem:[%s1552_s2 + $0xa4] sm:$0xf] %v460_v49  ;;  %v493_v61 = vpack.c.bf16 %v894_v12, %v490_v51  ;;  %v845_v0 = vld [vmem:[%s1550_s0 + $0x88] sm:$0xff] }
  0x2b   :  { %v842_v58 = vld [vmem:[%s1550_s0 + $0x178] sm:$0xff]  ;;  %v482_v60 = vpack.c.bf16 %v894_v12, %v479_v50  ;;  %v512_v62 = vsub.f32 %v839_v54, %v840_v57  ;;  %v846_v1 = vld [vmem:[%s1551_s1 + $0x88] sm:$0xff]  ;;  %829 = vst [vmem:[%s1552_s2 + $0x2c] sm:$0xf] %v471_v55 }
  0x2c   :  { %v843_v59 = vld [vmem:[%s1551_s1 + $0x178] sm:$0xff]  ;;  %v848_v2 = vld [vmem:[%s1550_s0 + $0x188] sm:$0xff]  ;;  %v504_v3 = vpack.c.bf16 %v894_v12, %v501_v56  ;;  %v534_v4 = vsub.f32 %v845_v0, %v846_v1  ;;  %835 = vst [vmem:[%s1552_s2 + $0x34] sm:$0xf] %v493_v61 }
  0x2d   :  { %v523_v63 = vsub.f32 %v842_v58, %v843_v59  ;;  %v849_v5 = vld [vmem:[%s1551_s1 + $0x188] sm:$0xff]  ;;  %v851_v6 = vld [vmem:[%s1550_s0 + $0x98] sm:$0xff]  ;;  %832 = vst [vmem:[%s1552_s2 + $0xac] sm:$0xf] %v482_v60  ;;  %v515_v8 = vpack.c.bf16 %v894_v12, %v512_v62 }
  0x2e   :  { %v852_v7 = vld [vmem:[%s1551_s1 + $0x98] sm:$0xff]  ;;  %v545_v10 = vsub.f32 %v848_v2, %v849_v5  ;;  %v857_v15 = vld [vmem:[%s1550_s0 + $0xa8] sm:$0xff]  ;;  %838 = vst [vmem:[%s1552_s2 + $0xb4] sm:$0xf] %v504_v3  ;;  %v537_v16 = vpack.c.bf16 %v894_v12, %v534_v4 }
  0x2f   :  { %v526_v9 = vpack.c.bf16 %v894_v12, %v523_v63  ;;  %v556_v11 = vsub.f32 %v851_v6, %v852_v7  ;;  %v854_v13 = vld [vmem:[%s1550_s0 + $0x198] sm:$0xff]  ;;  %v858_v18 = vld [vmem:[%s1551_s1 + $0xa8] sm:$0xff]  ;;  %841 = vst [vmem:[%s1552_s2 + $0x3c] sm:$0xf] %v515_v8 }
  0x30   :  { %v855_v14 = vld [vmem:[%s1551_s1 + $0x198] sm:$0xff]  ;;  %v860_v19 = vld [vmem:[%s1550_s0 + $0x1a8] sm:$0xff]  ;;  %v548_v21 = vpack.c.bf16 %v894_v12, %v545_v10  ;;  %v578_v23 = vsub.f32 %v857_v15, %v858_v18  ;;  %847 = vst [vmem:[%s1552_s2 + $0x44] sm:$0xf] %v537_v16 }
  0x31   :  { %v567_v17 = vsub.f32 %v854_v13, %v855_v14  ;;  %v861_v20 = vld [vmem:[%s1551_s1 + $0x1a8] sm:$0xff]  ;;  %844 = vst [vmem:[%s1552_s2 + $0xbc] sm:$0xf] %v526_v9  ;;  %v559_v22 = vpack.c.bf16 %v894_v12, %v556_v11  ;;  %v863_v25 = vld [vmem:[%s1550_s0 + $0xb8] sm:$0xff] }
  0x32   :  { %v589_v24 = vsub.f32 %v860_v19, %v861_v20  ;;  %v864_v26 = vld [vmem:[%s1551_s1 + $0xb8] sm:$0xff]  ;;  %v869_v31 = vld [vmem:[%s1550_s0 + $0xc8] sm:$0xff]  ;;  %850 = vst [vmem:[%s1552_s2 + $0xc4] sm:$0xf] %v548_v21  ;;  %v581_v33 = vpack.c.bf16 %v894_v12, %v578_v23 }
  0x33   :  { %v866_v27 = vld [vmem:[%s1550_s0 + $0x1b8] sm:$0xff]  ;;  %v570_v28 = vpack.c.bf16 %v894_v12, %v567_v17  ;;  %v600_v29 = vsub.f32 %v863_v25, %v864_v26  ;;  %v870_v32 = vld [vmem:[%s1551_s1 + $0xc8] sm:$0xff]  ;;  %853 = vst [vmem:[%s1552_s2 + $0x4c] sm:$0xf] %v559_v22 }
  0x34   :  { %v867_v30 = vld [vmem:[%s1551_s1 + $0x1b8] sm:$0xff]  ;;  %v592_v34 = vpack.c.bf16 %v894_v12, %v589_v24  ;;  %v622_v36 = vsub.f32 %v869_v31, %v870_v32  ;;  %v872_v37 = vld [vmem:[%s1550_s0 + $0x1c8] sm:$0xff]  ;;  %859 = vst [vmem:[%s1552_s2 + $0x54] sm:$0xf] %v581_v33 }
  0x35   :  { %v611_v35 = vsub.f32 %v866_v27, %v867_v30  ;;  %v873_v38 = vld [vmem:[%s1551_s1 + $0x1c8] sm:$0xff]  ;;  %v875_v39 = vld [vmem:[%s1550_s0 + $0xd8] sm:$0xff]  ;;  %856 = vst [vmem:[%s1552_s2 + $0xcc] sm:$0xf] %v570_v28  ;;  %v603_v40 = vpack.c.bf16 %v894_v12, %v600_v29 }
  0x36   :  { %v633_v41 = vsub.f32 %v872_v37, %v873_v38  ;;  %v876_v42 = vld [vmem:[%s1551_s1 + $0xd8] sm:$0xff]  ;;  %862 = vst [vmem:[%s1552_s2 + $0xd4] sm:$0xf] %v592_v34  ;;  %v625_v46 = vpack.c.bf16 %v894_v12, %v622_v36  ;;  %v881_v49 = vld [vmem:[%s1550_s0 + $0xe8] sm:$0xff] }
  0x37   :  { %v878_v43 = vld [vmem:[%s1550_s0 + $0x1d8] sm:$0xff]  ;;  %v614_v45 = vpack.c.bf16 %v894_v12, %v611_v35  ;;  %v644_v47 = vsub.f32 %v875_v39, %v876_v42  ;;  %v882_v50 = vld [vmem:[%s1551_s1 + $0xe8] sm:$0xff]  ;;  %865 = vst [vmem:[%s1552_s2 + $0x5c] sm:$0xf] %v603_v40 }
  0x38   :  { %v879_v44 = vld [vmem:[%s1551_s1 + $0x1d8] sm:$0xff]  ;;  %v884_v51 = vld [vmem:[%s1550_s0 + $0x1e8] sm:$0xff]  ;;  %v636_v52 = vpack.c.bf16 %v894_v12, %v633_v41  ;;  %v666_v53 = vsub.f32 %v881_v49, %v882_v50  ;;  %871 = vst [vmem:[%s1552_s2 + $0x64] sm:$0xf] %v625_v46 }
  0x39   :  { %v655_v48 = vsub.f32 %v878_v43, %v879_v44  ;;  %v885_v54 = vld [vmem:[%s1551_s1 + $0x1e8] sm:$0xff]  ;;  %v887_v55 = vld [vmem:[%s1550_s0 + $0xf8] sm:$0xff]  ;;  %868 = vst [vmem:[%s1552_s2 + $0xdc] sm:$0xf] %v614_v45  ;;  %v647_v57 = vpack.c.bf16 %v894_v12, %v644_v47 }
  0x3a   :  { %v888_v56 = vld [vmem:[%s1551_s1 + $0xf8] sm:$0xff]  ;;  %v677_v59 = vsub.f32 %v884_v51, %v885_v54  ;;  %874 = vst [vmem:[%s1552_s2 + $0xe4] sm:$0xf] %v636_v52  ;;  %v669_v63 = vpack.c.bf16 %v894_v12, %v666_v53 }
  0x3b   :  { %v658_v58 = vpack.c.bf16 %v894_v12, %v655_v48  ;;  %v688_v60 = vsub.f32 %v887_v55, %v888_v56  ;;  %v890_v61 = vld [vmem:[%s1550_s0 + $0x1f8] sm:$0xff]  ;;  %877 = vst [vmem:[%s1552_s2 + $0x6c] sm:$0xf] %v647_v57 }
  0x3c   :  { %v891_v62 = vld [vmem:[%s1551_s1 + $0x1f8] sm:$0xff]  ;;  %v680_v1 = vpack.c.bf16 %v894_v12, %v677_v59  ;;  %883 = vst [vmem:[%s1552_s2 + $0x74] sm:$0xf] %v669_v63 }
  0x3d   :  { %v699_v0 = vsub.f32 %v890_v61, %v891_v62  ;;  %880 = vst [vmem:[%s1552_s2 + $0xec] sm:$0xf] %v658_v58  ;;  %v691_v2 = vpack.c.bf16 %v894_v12, %v688_v60 }
  0x3e   :  { %886 = vst [vmem:[%s1552_s2 + $0xf4] sm:$0xf] %v680_v1 }
  0x3f   :  { %v702_v12 = vpack.c.bf16 %v894_v12, %v699_v0  ;;  %889 = vst [vmem:[%s1552_s2 + $0x7c] sm:$0xf] %v691_v2 }
  0x41   :  { %892 = vst [vmem:[%s1552_s2 + $0xfc] sm:$0xf] %v702_v12 }

// kernel: down_block.5
= control target key start
LH: loop header
LB: loop body
LE: loop exit
PB: predicated region body
PF: predicated region fallthrough
CT: control target
= control target key end

     0   :  { %s814_s0 = inlined_call_operand.<no memory space> [shape: f32[1], index: 0, kind: input, shape index: {}]   ;;  %s815_s1 = inlined_call_operand.vmem [shape: bf16[32,512], index: 1, kind: input, shape index: {}]   ;;  %s816_s2 = inlined_call_operand.vmem [shape: bf16[512,128], index: 2, kind: input, shape index: {}]   ;;  %s817_s3 = inlined_call_operand.vmem [shape: f32[1,128], index: 3, kind: input, shape index: {}]   ;;  %s818_s4 = inlined_call_operand.vmem [shape: f32[32,128], index: 4, kind: input, shape index: {}]   ;;  %s819_s5 = inlined_call_operand.hbm [shape: f32[32,128], index: 5, kind: output, shape index: {}]  }
   0x1   :  { %v574_v0 = vld [vmem:[%s816_s2 + $0x78] sm:$0xff]   ;;  %v578_v4 = vld [vmem:[%s816_s2 + $0x70] sm:$0xff]   ;;  %v582_v8 = vld [vmem:[%s816_s2 + $0x68] sm:$0xff]  }
   0x2   :  { %v575_v1 = vld [vmem:[%s816_s2 + $0xf8] sm:$0xff]   ;;  %515 = vmatprep.subr.bf16.mxu0 %v574_v0  ;;  %v579_v5 = vld [vmem:[%s816_s2 + $0xf0] sm:$0xff]   ;;  %v583_v9 = vld [vmem:[%s816_s2 + $0xe8] sm:$0xff]  }
   0x3   :  { %v576_v2 = vld [vmem:[%s816_s2 + $0x38] sm:$0xff]   ;;  %543 = vmatprep.subr.bf16.mxu1 %v575_v1  ;;  %v580_v6 = vld [vmem:[%s816_s2 + $0x30] sm:$0xff]   ;;  %v584_v10 = vld [vmem:[%s816_s2 + $0x28] sm:$0xff]  }
   0x4   :  { %v577_v3 = vld [vmem:[%s816_s2 + $0xb8] sm:$0xff]   ;;  %516 = vmatpush3.bf16.msra.mxu0 %v576_v2  ;;  %v581_v7 = vld [vmem:[%s816_s2 + $0xb0] sm:$0xff]   ;;  %v585_v11 = vld [vmem:[%s816_s2 + $0xa8] sm:$0xff]  }
   0x5   :  { %544 = vmatpush3.bf16.msra.mxu1 %v577_v3  ;;  %517 = vmatprep.subr.bf16.mxu0 %v578_v4  ;;  %v586_v12 = vld [vmem:[%s816_s2 + $0x60] sm:$0xff]   ;;  %v590_v16 = vld [vmem:[%s816_s2 + $0x58] sm:$0xff]   ;;  %v594_v20 = vld [vmem:[%s816_s2 + $0x50] sm:$0xff]  }
   0x6   :  { %545 = vmatprep.subr.bf16.mxu1 %v579_v5  ;;  %v587_v13 = vld [vmem:[%s816_s2 + $0xe0] sm:$0xff]   ;;  %v591_v17 = vld [vmem:[%s816_s2 + $0xd8] sm:$0xff]   ;;  %v595_v21 = vld [vmem:[%s816_s2 + $0xd0] sm:$0xff]  }
   0x7   :  { %v588_v14 = vld [vmem:[%s816_s2 + $0x20] sm:$0xff]   ;;  %v592_v18 = vld [vmem:[%s816_s2 + $0x18] sm:$0xff]   ;;  %v596_v22 = vld [vmem:[%s816_s2 + $0x10] sm:$0xff]  }
   0x8   :  { %518 = vmatpush3.bf16.msra.mxu0 %v580_v6  ;;  %v589_v15 = vld [vmem:[%s816_s2 + $0xa0] sm:$0xff]   ;;  %v593_v19 = vld [vmem:[%s816_s2 + $0x98] sm:$0xff]   ;;  %v597_v23 = vld [vmem:[%s816_s2 + $0x90] sm:$0xff]  }
   0x9   :  { %546 = vmatpush3.bf16.msra.mxu1 %v581_v7  ;;  %519 = vmatprep.subr.bf16.mxu0 %v582_v8  ;;  %v598_v24 = vld [vmem:[%s816_s2 + $0x48] sm:$0xff]   ;;  %v602_v28 = vld [vmem:[%s816_s2 + $0x40] sm:$0xff]  }
   0xa   :  { %547 = vmatprep.subr.bf16.mxu1 %v583_v9  ;;  %v599_v25 = vld [vmem:[%s816_s2 + $0xc8] sm:$0xff]   ;;  %v603_v29 = vld [vmem:[%s816_s2 + $0xc0] sm:$0xff]  }
   0xb   :  { %v600_v26 = vld [vmem:[%s816_s2 + $0x8] sm:$0xff]   ;;  %v604_v30 = vld [vmem:[%s816_s2] sm:$0xff]  }
   0xc   :  { %520 = vmatpush3.bf16.msra.mxu0 %v584_v10  ;;  %v601_v27 = vld [vmem:[%s816_s2 + $0x88] sm:$0xff]   ;;  %v605_v31 = vld [vmem:[%s816_s2 + $0x80] sm:$0xff]  }
   0xd   :  { %548 = vmatpush3.bf16.msra.mxu1 %v585_v11  ;;  %521 = vmatprep.subr.bf16.mxu0 %v586_v12  ;;  %v606_v32 = vld [vmem:[%s815_s1] ss:$16 sps:$4 sm:$0xff]   ;;  %v608_v33 = vld [vmem:[%s815_s1 + $0x4] ss:$16 sps:$4 sm:$0xff]   ;;  %v609_v34 = vld [vmem:[%s815_s1 + $0x8] ss:$16 sps:$4 sm:$0xff]  }
   0xe   :  { %549 = vmatprep.subr.bf16.mxu1 %v587_v13  ;;  %v611_v35 = vld [vmem:[%s815_s1 + $0xc] ss:$16 sps:$4 sm:$0xff]   ;;  %366 = vmatprep.mubr.bf16.mxu0 %v608_v33  ;;  %v612_v36 = vld [vmem:[%s815_s1 + $0x24] ss:$16 sps:$4 sm:$0xff]  }
   0xf   :  { %415 = vmatprep.mubr.bf16.mxu1 %v611_v35  ;;  %v614_v37 = vld [vmem:[%s815_s1 + $0x2c] ss:$16 sps:$4 sm:$0xff]  }
  0x10   :  { %522 = vmatpush3.bf16.msra.mxu0 %v588_v14 }
  0x11   :  { %550 = vmatpush3.bf16.msra.mxu1 %v589_v15  ;;  %523 = vmatprep.subr.bf16.mxu0 %v590_v16 }
  0x12   :  { %551 = vmatprep.subr.bf16.mxu1 %v591_v17 }
  0x14   :  { %524 = vmatpush3.bf16.msra.mxu0 %v592_v18 }
  0x15   :  { %552 = vmatpush3.bf16.msra.mxu1 %v593_v19  ;;  %525 = vmatprep.subr.bf16.mxu0 %v594_v20 }
  0x16   :  { %553 = vmatprep.subr.bf16.mxu1 %v595_v21 }
  0x18   :  { %526 = vmatpush3.bf16.msra.mxu0 %v596_v22 }
  0x19   :  { %554 = vmatpush3.bf16.msra.mxu1 %v597_v23  ;;  %527 = vmatprep.subr.bf16.mxu0 %v598_v24 }
  0x1a   :  { %555 = vmatprep.subr.bf16.mxu1 %v599_v25 }
  0x1c   :  { %528 = vmatpush3.bf16.msra.mxu0 %v600_v26 }
  0x1d   :  { %556 = vmatpush3.bf16.msra.mxu1 %v601_v27  ;;  %529 = vmatprep.subr.bf16.mxu0 %v602_v28 }
  0x1e   :  { %557 = vmatprep.subr.bf16.mxu1 %v603_v29 }
  0x20   :  { %530 = vmatpush3.bf16.msra.mxu0 %v604_v30 }
  0x21   :  { %558 = vmatpush3.bf16.msra.mxu1 %v605_v31 }
  0x23   :  { %367 = vmatmul.mubr.bf16.vlgmr.msra.gmra.mxu0 %v606_v32 }
  0x24   :  { %416 = vmatmul.mubr.bf16.vlgmr.msra.gmra.mxu1 %v609_v34  ;;  %374 = vmatprep.mubr.bf16.mxu0 %v612_v36 }
  0x25   :  { %11 = vsyncpa [#allocation4], 0  ;;  %423 = vmatprep.mubr.bf16.mxu1 %v614_v37  ;;  %v616_v38 = vld [vmem:[%s815_s1 + $0x20] ss:$16 sps:$4 sm:$0xff]   ;;  %v617_v39 = vld [vmem:[%s815_s1 + $0x28] ss:$16 sps:$4 sm:$0xff]   ;;  %v437_v50 = vstv %s814_s0 }
  0x26   :  { %v474_v42 = vld [vmem:[%s817_s3] ss:$0 sm:$0xff]  ;;  %v447_v5 = vld [vmem:[%s818_s4 + $0x8] sm:$0xff]  ;;  %v448_v16 = vld [vmem:[%s818_s4 + $0x10] sm:$0xff]  ;;  %s640_s6 = smov [#allocation3]  }
  0x27   :  { %v446_v57 = vld [vmem:[%s818_s4] sm:$0xff]  ;;  %v449_v23 = vld [vmem:[%s818_s4 + $0x18] sm:$0xff]  ;;  %s463_s7 = sshll.u32 %s640_s6, 4  ;;  %s464_s7 = int_to_ptr.vmem [resolvable:$true] %s463_s7 }
  0x28   :  { %s618_s8 = scalar_lea.vmem %s464_s7, 512  ;;  %p623_p1 = scmp.lt.s32.totalorder %s464_s7, %s464_s7 }
  0x29   :  { %p619_p0 = scmp.ne.s32.totalorder %s464_s7, %s618_s8  ;;  %p624_p2 = scmp.lt.s32.totalorder %s618_s8, %s618_s8 }
  0x2b   :  { %375 = vmatmul.mubr.bf16.gmra.mxu0 %v616_v38  ;;  %p625_p3 = por %p624_p2, %p623_p1 }
  0x2c   :  { %424 = vmatmul.mubr.bf16.gmra.mxu1 %v617_v39 }
  0x2d   :  { %p626_p4 = pnand %p625_p3, %p619_p0 }
  0xe3   :  { %v531_v40 = vpop.f32.mrf.mxu0 }
  0xe4   :  { %v559_v41 = vpop.f32.mrf.mxu1 }
  0xe5   :  { %v532_v43 = vpop.f32.mrf.mxu0 }
  0xe6   :  { %v533_v44 = vadd.f32 %v532_v43, %v531_v40  ;;  %v560_v45 = vpop.f32.mrf.mxu1 }
  0xe7   :  { %v534_v46 = vpop.f32.mrf.mxu0  ;;  %v561_v48 = vadd.f32 %v560_v45, %v559_v41 }
  0xe8   :  { %v369_v47 = vadd.f32 %v533_v44, %v474_v42  ;;  %v562_v49 = vpop.f32.mrf.mxu1 }
  0xe9   :  { %v535_v51 = vpop.f32.mrf.mxu0 }
  0xea   :  { %v418_v52 = vadd.f32 %v561_v48, %v369_v47  ;;  %v536_v53 = vadd.f32 %v535_v51, %v534_v46  ;;  %v563_v54 = vpop.f32.mrf.mxu1 }
  0xeb   :  { %v537_v55 = vpop.f32.mrf.mxu0  ;;  %v564_v59 = vadd.f32 %v563_v54, %v562_v49 }
  0xec   :  { %vm433_vm0 = vcmp.ge.f32.partialorder %v418_v52, 0.0  ;;  %v438_v56 = vmul.f32 %v437_v50, %v418_v52  ;;  %v372_v58 = vadd.f32 %v536_v53, %v474_v42  ;;  %v565_v60 = vpop.f32.mrf.mxu1 }
  0xed   :  { %v538_v61 = vpop.f32.mrf.mxu0 }
  0xee   :  { %v442_v62 = vsel %vm433_vm0, %v418_v52, %v438_v56  ;;  %v421_v63 = vadd.f32 %v564_v59, %v372_v58  ;;  %v539_v0 = vadd.f32 %v538_v61, %v537_v55  ;;  %v566_v1 = vpop.f32.mrf.mxu1 }
  0xef   :  { %v450_v2 = vadd.f32 %v446_v57, %v442_v62  ;;  %v540_v3 = vpop.f32.mrf.mxu0  ;;  %v567_v7 = vadd.f32 %v566_v1, %v565_v60 }
  0xf0   :  { %vm434_vm1 = vcmp.ge.f32.partialorder %v421_v63, 0.0  ;;  %v439_v4 = vmul.f32 %v437_v50, %v421_v63  ;;  %v377_v6 = vadd.f32 %v539_v0, %v474_v42  ;;  %v568_v8 = vpop.f32.mrf.mxu1 }
  0xf1   :  { %454 = vst [vmem:[#allocation3] sm:$0xff] %v450_v2  ;;  %v541_v9 = vpop.f32.mrf.mxu0 }
  0xf2   :  { %v443_v10 = vsel %vm434_vm1, %v421_v63, %v439_v4  ;;  %v426_v11 = vadd.f32 %v567_v7, %v377_v6  ;;  %v542_v12 = vadd.f32 %v541_v9, %v540_v3  ;;  %v569_v13 = vpop.f32.mrf.mxu1 }
  0xf3   :  { %v451_v14 = vadd.f32 %v447_v5, %v443_v10  ;;  %v570_v18 = vadd.f32 %v569_v13, %v568_v8 }
  0xf4   :  { %vm435_vm2 = vcmp.ge.f32.partialorder %v426_v11, 0.0  ;;  %v440_v15 = vmul.f32 %v437_v50, %v426_v11  ;;  %v380_v17 = vadd.f32 %v542_v12, %v474_v42 }
  0xf5   :  { %455 = vst [vmem:[#allocation3 + $0x8] sm:$0xff] %v451_v14 }
  0xf6   :  { %v444_v19 = vsel %vm435_vm2, %v426_v11, %v440_v15  ;;  %v429_v20 = vadd.f32 %v570_v18, %v380_v17 }
  0xf7   :  { %v452_v21 = vadd.f32 %v448_v16, %v444_v19 }
  0xf8   :  { %vm436_vm3 = vcmp.ge.f32.partialorder %v429_v20, 0.0  ;;  %v441_v22 = vmul.f32 %v437_v50, %v429_v20 }
  0xf9   :  { %456 = vst [vmem:[#allocation3 + $0x10] sm:$0xff] %v452_v21 }
  0xfa   :  { %v445_v24 = vsel %vm436_vm3, %v429_v20, %v441_v22 }
  0xfb   :  { %v453_v25 = vadd.f32 %v449_v23, %v445_v24 }
  0xfd   :  { %457 = vst [vmem:[#allocation3 + $0x18] sm:$0xff] %v453_v25 }
  0xfe   :  { %629 = shalt.err (!%p626_p4)
}
  0xff   :  { %s641_s9 = smov 128   ;;  %s642_s10 = smov 8  }
 0x100   :  { %469 = dma.vmem_to_hbm [thread:$0]  %s464_s7, 512, %s819_s5, [#allocation4], %s641_s9, %s641_s9, %s642_s10  }
 0x101   :  { %638 = dma.done.wait [#allocation4], 512  }
 0x102   :  { %639 = vsyncadd [#allocation4], 4294966784 }
 0x103   :  { %473 = vsyncpa [#allocation4], 1 }

</bundles_post_ra>
